<compile_context>
chip_gen: v5e
topology: v5e:2x2
jax: 0.10.0
libtpu: 0.0.40
codegen_flags: <defaults>
</compile_context>

<pallas_src>
import jax
import jax.numpy as jnp
from jax.experimental import pallas as pl
from jax.experimental.pallas import tpu as pltpu

LANE = 128
BATCH_BLOCK = 8  # f32 sublane tile; one batch block per grid step


def _round_up(x, m):
    return (x + m - 1) // m * m


def bigru_fc_kernel(emb_ref,    # (T, Bb, E)   f32
                    wih_ref,    # (E, 6H)      bf16  cols = [fwd r|z|n , bwd r|z|n]
                    bih_ref,    # (1, 6H)      f32
                    whh_ref,    # (2H, 6H)     bf16  block-diagonal [fwd ; bwd]
                    bhh_ref,    # (1, 6H)      f32
                    fcw_ref,    # (2H, Opad)   bf16
                    fcb_ref,    # (1, Opad)    f32
                    out_ref,    # (Bb, Opad)   f32
                    gi_ref):    # scratch (T*Bb, 6H) f32
    T = emb_ref.shape[0]
    Bb = emb_ref.shape[1]
    E = emb_ref.shape[2]
    H = whh_ref.shape[0] // 2

    # ---- Hoisted input projection: one batched matmul for all timesteps ------
    x = emb_ref[...].reshape(T * Bb, E).astype(jnp.bfloat16)        # (T*Bb, E)
    gi = jnp.dot(x, wih_ref[...], preferred_element_type=jnp.float32)
    gi_ref[...] = gi + bih_ref[...]                                 # (T*Bb, 6H)

    whh = whh_ref[...]                                              # (2H, 6H) bf16
    bhh = jnp.broadcast_to(bhh_ref[...], (Bb, 6 * H))               # hoisted bcast

    # Hidden state for both directions packed side by side: [h_fwd | h_bwd]
    h = jnp.zeros((Bb, 2 * H), jnp.float32)

    # ---- Recurrence: fully unrolled, one fused MXU push per step -------------
    for t in range(T):
        gh = jnp.dot(h.astype(jnp.bfloat16), whh,
                     preferred_element_type=jnp.float32) + bhh      # (Bb, 6H)

        gif = gi_ref[pl.ds(t * Bb, Bb), :]             # fwd reads x_t
        gib = gi_ref[pl.ds((T - 1 - t) * Bb, Bb), :]   # bwd reads x_{T-1-t}

        hf = h[:, 0:H]
        hb = h[:, H:2 * H]

        # PyTorch GRU gate order [r | z | n]; n uses r * (W_hn h + b_hn).
        r_f = jax.nn.sigmoid(gif[:, 0:H] + gh[:, 0:H])
        z_f = jax.nn.sigmoid(gif[:, H:2 * H] + gh[:, H:2 * H])
        n_f = jnp.tanh(gif[:, 2 * H:3 * H] + r_f * gh[:, 2 * H:3 * H])
        hf = (1.0 - z_f) * n_f + z_f * hf

        r_b = jax.nn.sigmoid(gib[:, 3 * H:4 * H] + gh[:, 3 * H:4 * H])
        z_b = jax.nn.sigmoid(gib[:, 4 * H:5 * H] + gh[:, 4 * H:5 * H])
        n_b = jnp.tanh(gib[:, 5 * H:6 * H] + r_b * gh[:, 5 * H:6 * H])
        hb = (1.0 - z_b) * n_b + z_b * hb

        h = jnp.concatenate([hf, hb], axis=1)

    # ---- Final Linear (dropout == identity in eval); lane-dense store --------
    out_ref[...] = (jnp.dot(h.astype(jnp.bfloat16), fcw_ref[...],
                            preferred_element_type=jnp.float32)
                    + fcb_ref[...])


def init_params(key, vocab_size, embed_dim, hidden_dim, output_dim, pad_idx):
    ks = jax.random.split(key, 12)
    s = 0.1
    p = {
        "embedding": jax.random.normal(ks[0], (vocab_size, embed_dim), jnp.float32) * s,
        # PyTorch GRU param shapes: weight_ih (3H, E), weight_hh (3H, H), biases (3H,)
        "w_ih_f": jax.random.normal(ks[1], (3 * hidden_dim, embed_dim), jnp.float32) * s,
        "w_hh_f": jax.random.normal(ks[2], (3 * hidden_dim, hidden_dim), jnp.float32) * s,
        "b_ih_f": jax.random.normal(ks[3], (3 * hidden_dim,), jnp.float32) * s,
        "b_hh_f": jax.random.normal(ks[4], (3 * hidden_dim,), jnp.float32) * s,
        "w_ih_b": jax.random.normal(ks[5], (3 * hidden_dim, embed_dim), jnp.float32) * s,
        "w_hh_b": jax.random.normal(ks[6], (3 * hidden_dim, hidden_dim), jnp.float32) * s,
        "b_ih_b": jax.random.normal(ks[7], (3 * hidden_dim,), jnp.float32) * s,
        "b_hh_b": jax.random.normal(ks[8], (3 * hidden_dim,), jnp.float32) * s,
        # Linear: weight (O, 2H), bias (O,)
        "fc_w": jax.random.normal(ks[9], (output_dim, 2 * hidden_dim), jnp.float32) * s,
        "fc_b": jax.random.normal(ks[10], (output_dim,), jnp.float32) * s,
    }
    p["embedding"] = p["embedding"].at[pad_idx].set(0.0)   # padding_idx row is zero
    return p


def model_forward(tokens, params, *, batch_block=BATCH_BLOCK):
    # tokens: (B, T) int32
    B, T = tokens.shape
    E = params["embedding"].shape[1]
    H = params["w_hh_f"].shape[1]
    O = params["fc_w"].shape[0]
    O_pad = max(LANE, _round_up(O, LANE))

    Bb = min(batch_block, _round_up(B, 8))
    B_pad = _round_up(B, Bb)
    if B_pad != B:
        tokens = jnp.pad(tokens, ((0, B_pad - B), (0, 0)))   # pad rows sliced off later

    # Time-major embedding gather directly: (T, B_pad, E), no extra transpose pass.
    emb = jnp.take(params["embedding"], tokens.T, axis=0).astype(jnp.float32)

    # ---- fused / pre-transposed weights --------------------------------------
    # Input projection (E, 6H): columns [fwd r|z|n , bwd r|z|n].
    wih = jnp.concatenate([params["w_ih_f"].T, params["w_ih_b"].T], axis=1)
    bih = jnp.concatenate([params["b_ih_f"], params["b_ih_b"]]).reshape(1, -1)
    # Hidden projection as block-diagonal (2H, 6H): one matmul per step covers both dirs.
    whh = jnp.zeros((2 * H, 6 * H), jnp.float32)
    whh = whh.at[:H, :3 * H].set(params["w_hh_f"].T)
    whh = whh.at[H:, 3 * H:].set(params["w_hh_b"].T)
    bhh = jnp.concatenate([params["b_hh_f"], params["b_hh_b"]]).reshape(1, -1)
    # FC padded to lane-dense width.
    fcw = jnp.zeros((2 * H, O_pad), jnp.float32).at[:, :O].set(params["fc_w"].T)
    fcb = jnp.zeros((1, O_pad), jnp.float32).at[:, :O].set(params["fc_b"])

    # bf16 MXU operands; biases stay f32 (f32 accumulation everywhere).
    wih = wih.astype(jnp.bfloat16)
    whh = whh.astype(jnp.bfloat16)
    fcw = fcw.astype(jnp.bfloat16)

    grid = (B_pad // Bb,)
    out = pl.pallas_call(
        bigru_fc_kernel,
        out_shape=jax.ShapeDtypeStruct((B_pad, O_pad), jnp.float32),
        grid_spec=pltpu.PrefetchScalarGridSpec(
            num_scalar_prefetch=0,
            grid=grid,
            in_specs=[
                pl.BlockSpec((T, Bb, E), lambda i: (0, i, 0)),      # emb (batch-blocked)
                pl.BlockSpec((E, 6 * H), lambda i: (0, 0)),         # wih
                pl.BlockSpec((1, 6 * H), lambda i: (0, 0)),         # bih
                pl.BlockSpec((2 * H, 6 * H), lambda i: (0, 0)),     # whh (block-diag)
                pl.BlockSpec((1, 6 * H), lambda i: (0, 0)),         # bhh
                pl.BlockSpec((2 * H, O_pad), lambda i: (0, 0)),     # fc weight
                pl.BlockSpec((1, O_pad), lambda i: (0, 0)),         # fc bias
            ],
            out_specs=pl.BlockSpec((Bb, O_pad), lambda i: (i, 0)),
            scratch_shapes=[pltpu.VMEM((T * Bb, 6 * H), jnp.float32)],
        ),
        compiler_params=pltpu.CompilerParams(
            dimension_semantics=("parallel",),        # batch blocks -> both TCs on v7x
            vmem_limit_bytes=32 * 1024 * 1024,
        ),
    )(emb, wih, bih, whh, bhh, fcw, fcb)

    return out[:B, :O]


def reference_forward(tokens, params):
    """Pure-JAX f32 reference reproducing PyTorch semantics (eval mode)."""
    emb = jnp.take(params["embedding"], tokens, axis=0)   # (B, T, E)
    H = params["w_hh_f"].shape[1]

    def cell(x, h, wih, whh, bih, bhh):
        gi = x @ wih.T + bih
        gh = h @ whh.T + bhh
        r = jax.nn.sigmoid(gi[:, :H] + gh[:, :H])
        z = jax.nn.sigmoid(gi[:, H:2 * H] + gh[:, H:2 * H])
        n = jnp.tanh(gi[:, 2 * H:] + r * gh[:, 2 * H:])
        return (1.0 - z) * n + z * h

    B, T, _ = emb.shape
    hf = jnp.zeros((B, H), jnp.float32)
    hb = jnp.zeros((B, H), jnp.float32)
    for t in range(T):
        hf = cell(emb[:, t], hf, params["w_ih_f"], params["w_hh_f"],
                  params["b_ih_f"], params["b_hh_f"])
        hb = cell(emb[:, T - 1 - t], hb, params["w_ih_b"], params["w_hh_b"],
                  params["b_ih_b"], params["b_hh_b"])
    h = jnp.concatenate([hf, hb], axis=1)
    return h @ params["fc_w"].T + params["fc_b"]


if __name__ == "__main__":
    # Small shapes consistent with the module; B=16 -> two batch blocks so the
    # "parallel" grid axis exercises both TensorCores on v7x.
    VOCAB, EMBED, HIDDEN, OUT, PAD = 50, 32, 32, 4, 0
    B, T = 16, 8

    key = jax.random.PRNGKey(0)
    k_param, k_tok = jax.random.split(key)
    params = init_params(k_param, VOCAB, EMBED, HIDDEN, OUT, PAD)
    tokens = jax.random.randint(k_tok, (B, T), 0, VOCAB, dtype=jnp.int32)

    out = jax.jit(model_forward)(tokens, params)
    out = jax.block_until_ready(out)

    ref = reference_forward(tokens, params)
    assert out.shape == (B, OUT), out.shape
    max_diff = jnp.max(jnp.abs(out - ref))
    assert jnp.allclose(out, ref, rtol=1e-2, atol=1e-2), f"max abs diff {max_diff}"

    print("KERNEL_OK")
</pallas_src>

<mosaic_0001>
module attributes {stable_mosaic.version = 11 : i64} {
  func.func @bigru_fc_kernel(%arg0: i32, %arg1: memref<8x8x32xf32, #tpu.memory_space<vmem>>, %arg2: memref<32x192xbf16, #tpu.memory_space<vmem>>, %arg3: memref<1x192xf32, #tpu.memory_space<vmem>>, %arg4: memref<64x192xbf16, #tpu.memory_space<vmem>>, %arg5: memref<1x192xf32, #tpu.memory_space<vmem>>, %arg6: memref<64x128xbf16, #tpu.memory_space<vmem>>, %arg7: memref<1x128xf32, #tpu.memory_space<vmem>>, %arg8: memref<8x128xf32, #tpu.memory_space<vmem>>, %arg9: memref<64x192xf32, #tpu.memory_space<vmem>>) attributes {dimension_semantics = [#tpu.dimension_semantics<parallel>], iteration_bounds = array<i64: 2>, scalar_prefetch = 0 : i64, scratch_operands = 1 : i64, tpu.core_type = #tpu.core_type<tc>, window_params = [{transform_indices = @transform_0, window_bounds = array<i64: 8, 8, 32>}, {pipeline_mode = #tpu.pipeline_mode<synchronous>, transform_indices = @transform_1, window_bounds = array<i64: 32, 192>}, {pipeline_mode = #tpu.pipeline_mode<synchronous>, transform_indices = @transform_2, window_bounds = array<i64: 1, 192>}, {pipeline_mode = #tpu.pipeline_mode<synchronous>, transform_indices = @transform_3, window_bounds = array<i64: 64, 192>}, {pipeline_mode = #tpu.pipeline_mode<synchronous>, transform_indices = @transform_4, window_bounds = array<i64: 1, 192>}, {pipeline_mode = #tpu.pipeline_mode<synchronous>, transform_indices = @transform_5, window_bounds = array<i64: 64, 128>}, {pipeline_mode = #tpu.pipeline_mode<synchronous>, transform_indices = @transform_6, window_bounds = array<i64: 1, 128>}, {transform_indices = @transform_7, window_bounds = array<i64: 8, 128>}]} {
    %c0 = arith.constant 0 : index
    %c0_0 = arith.constant 0 : index
    %c0_1 = arith.constant 0 : index
    %0 = vector.load %arg1[%c0, %c0_0, %c0_1] : memref<8x8x32xf32, #tpu.memory_space<vmem>>, vector<8x8x32xf32>
    %1 = vector.shape_cast %0 : vector<8x8x32xf32> to vector<64x32xf32>
    %2 = arith.truncf %1 : vector<64x32xf32> to vector<64x32xbf16>
    %c0_2 = arith.constant 0 : index
    %c0_3 = arith.constant 0 : index
    %3 = vector.load %arg2[%c0_2, %c0_3] : memref<32x192xbf16, #tpu.memory_space<vmem>>, vector<32x192xbf16>
    %cst = arith.constant dense<0.000000e+00> : vector<64x192xf32>
    %4 = tpu.matmul %2, %3, %cst {dimension_numbers = #tpu.dot_dimension_numbers<[1], [0], [0], [1], [0, 0, 1, 1], [], []>} : vector<64x32xbf16>, vector<32x192xbf16>, vector<64x192xf32> -> vector<64x192xf32>
    %c0_4 = arith.constant 0 : index
    %c0_5 = arith.constant 0 : index
    %5 = vector.load %arg3[%c0_4, %c0_5] : memref<1x192xf32, #tpu.memory_space<vmem>>, vector<1x192xf32>
    %6 = vector.broadcast %5 : vector<1x192xf32> to vector<64x192xf32>
    %7 = arith.addf %4, %6 : vector<64x192xf32>
    %c0_6 = arith.constant 0 : index
    %c0_7 = arith.constant 0 : index
    %8 = vector.load %arg9[%c0_6, %c0_7] : memref<64x192xf32, #tpu.memory_space<vmem>>, vector<64x192xf32>
    tpu.vector_store %arg9[%c0_6, %c0_7], %7 {strides = array<i32>} : memref<64x192xf32, #tpu.memory_space<vmem>>, vector<64x192xf32>,
    %c0_8 = arith.constant 0 : index
    %c0_9 = arith.constant 0 : index
    %9 = vector.load %arg4[%c0_8, %c0_9] : memref<64x192xbf16, #tpu.memory_space<vmem>>, vector<64x192xbf16>
    %c0_10 = arith.constant 0 : index
    %c0_11 = arith.constant 0 : index
    %10 = vector.load %arg5[%c0_10, %c0_11] : memref<1x192xf32, #tpu.memory_space<vmem>>, vector<1x192xf32>
    %11 = vector.shape_cast %10 : vector<1x192xf32> to vector<1x192xf32>
    %12 = vector.broadcast %11 : vector<1x192xf32> to vector<8x192xf32>
    %cst_12 = arith.constant 0.000000e+00 : f32
    %13 = vector.broadcast %cst_12 : f32 to vector<8x64xf32>
    %14 = arith.truncf %13 : vector<8x64xf32> to vector<8x64xbf16>
    %cst_13 = arith.constant dense<0.000000e+00> : vector<8x192xf32>
    %15 = tpu.matmul %14, %9, %cst_13 {dimension_numbers = #tpu.dot_dimension_numbers<[1], [0], [0], [1], [0, 0, 1, 1], [], []>} : vector<8x64xbf16>, vector<64x192xbf16>, vector<8x192xf32> -> vector<8x192xf32>
    %16 = arith.addf %15, %12 : vector<8x192xf32>
    %c0_14 = arith.constant 0 : index
    %c0_15 = arith.constant 0 : index
    %17 = vector.load %arg9[%c0_14, %c0_15] : memref<64x192xf32, #tpu.memory_space<vmem>>, vector<8x192xf32>
    %c56 = arith.constant 56 : index
    %c0_16 = arith.constant 0 : index
    %18 = vector.load %arg9[%c56, %c0_16] : memref<64x192xf32, #tpu.memory_space<vmem>>, vector<8x192xf32>
    %19 = vector.extract_strided_slice %13 {offsets = [0, 0], sizes = [8, 32], strides = [1, 1]} : vector<8x64xf32> to vector<8x32xf32>
    %20 = vector.extract_strided_slice %13 {offsets = [0, 32], sizes = [8, 32], strides = [1, 1]} : vector<8x64xf32> to vector<8x32xf32>
    %21 = vector.extract_strided_slice %17 {offsets = [0, 0], sizes = [8, 32], strides = [1, 1]} : vector<8x192xf32> to vector<8x32xf32>
    %22 = vector.extract_strided_slice %16 {offsets = [0, 0], sizes = [8, 32], strides = [1, 1]} : vector<8x192xf32> to vector<8x32xf32>
    %23 = arith.addf %21, %22 : vector<8x32xf32>
    %24 = arith.negf %23 : vector<8x32xf32>
    %25 = math.exp %24 : vector<8x32xf32>
    %cst_17 = arith.constant 1.000000e+00 : f32
    %26 = vector.broadcast %cst_17 : f32 to vector<8x32xf32>
    %27 = arith.addf %26, %25 : vector<8x32xf32>
    %28 = arith.divf %26, %27 : vector<8x32xf32>
    %29 = vector.extract_strided_slice %17 {offsets = [0, 32], sizes = [8, 32], strides = [1, 1]} : vector<8x192xf32> to vector<8x32xf32>
    %30 = vector.extract_strided_slice %16 {offsets = [0, 32], sizes = [8, 32], strides = [1, 1]} : vector<8x192xf32> to vector<8x32xf32>
    %31 = arith.addf %29, %30 : vector<8x32xf32>
    %32 = arith.negf %31 : vector<8x32xf32>
    %33 = math.exp %32 : vector<8x32xf32>
    %cst_18 = arith.constant 1.000000e+00 : f32
    %34 = vector.broadcast %cst_18 : f32 to vector<8x32xf32>
    %35 = arith.addf %34, %33 : vector<8x32xf32>
    %36 = arith.divf %34, %35 : vector<8x32xf32>
    %37 = vector.extract_strided_slice %17 {offsets = [0, 64], sizes = [8, 32], strides = [1, 1]} : vector<8x192xf32> to vector<8x32xf32>
    %38 = vector.extract_strided_slice %16 {offsets = [0, 64], sizes = [8, 32], strides = [1, 1]} : vector<8x192xf32> to vector<8x32xf32>
    %39 = arith.mulf %28, %38 : vector<8x32xf32>
    %40 = arith.addf %37, %39 : vector<8x32xf32>
    %41 = math.tanh %40 : vector<8x32xf32>
    %cst_19 = arith.constant 1.000000e+00 : f32
    %42 = vector.broadcast %cst_19 : f32 to vector<8x32xf32>
    %43 = arith.subf %42, %36 : vector<8x32xf32>
    %44 = arith.mulf %43, %41 : vector<8x32xf32>
    %45 = arith.mulf %36, %19 : vector<8x32xf32>
    %46 = arith.addf %44, %45 : vector<8x32xf32>
    %47 = vector.extract_strided_slice %18 {offsets = [0, 96], sizes = [8, 32], strides = [1, 1]} : vector<8x192xf32> to vector<8x32xf32>
    %48 = vector.extract_strided_slice %16 {offsets = [0, 96], sizes = [8, 32], strides = [1, 1]} : vector<8x192xf32> to vector<8x32xf32>
    %49 = arith.addf %47, %48 : vector<8x32xf32>
    %50 = arith.negf %49 : vector<8x32xf32>
    %51 = math.exp %50 : vector<8x32xf32>
    %cst_20 = arith.constant 1.000000e+00 : f32
    %52 = vector.broadcast %cst_20 : f32 to vector<8x32xf32>
    %53 = arith.addf %52, %51 : vector<8x32xf32>
    %54 = arith.divf %52, %53 : vector<8x32xf32>
    %55 = vector.extract_strided_slice %18 {offsets = [0, 128], sizes = [8, 32], strides = [1, 1]} : vector<8x192xf32> to vector<8x32xf32>
    %56 = vector.extract_strided_slice %16 {offsets = [0, 128], sizes = [8, 32], strides = [1, 1]} : vector<8x192xf32> to vector<8x32xf32>
    %57 = arith.addf %55, %56 : vector<8x32xf32>
    %58 = arith.negf %57 : vector<8x32xf32>
    %59 = math.exp %58 : vector<8x32xf32>
    %cst_21 = arith.constant 1.000000e+00 : f32
    %60 = vector.broadcast %cst_21 : f32 to vector<8x32xf32>
    %61 = arith.addf %60, %59 : vector<8x32xf32>
    %62 = arith.divf %60, %61 : vector<8x32xf32>
    %63 = vector.extract_strided_slice %18 {offsets = [0, 160], sizes = [8, 32], strides = [1, 1]} : vector<8x192xf32> to vector<8x32xf32>
    %64 = vector.extract_strided_slice %16 {offsets = [0, 160], sizes = [8, 32], strides = [1, 1]} : vector<8x192xf32> to vector<8x32xf32>
    %65 = arith.mulf %54, %64 : vector<8x32xf32>
    %66 = arith.addf %63, %65 : vector<8x32xf32>
    %67 = math.tanh %66 : vector<8x32xf32>
    %cst_22 = arith.constant 1.000000e+00 : f32
    %68 = vector.broadcast %cst_22 : f32 to vector<8x32xf32>
    %69 = arith.subf %68, %62 : vector<8x32xf32>
    %70 = arith.mulf %69, %67 : vector<8x32xf32>
    %71 = arith.mulf %62, %20 : vector<8x32xf32>
    %72 = arith.addf %70, %71 : vector<8x32xf32>
    %73 = tpu.concatenate %46, %72 in 1 : vector<8x32xf32>, vector<8x32xf32> -> vector<8x64xf32>
    %74 = arith.truncf %73 : vector<8x64xf32> to vector<8x64xbf16>
    %cst_23 = arith.constant dense<0.000000e+00> : vector<8x192xf32>
    %75 = tpu.matmul %74, %9, %cst_23 {dimension_numbers = #tpu.dot_dimension_numbers<[1], [0], [0], [1], [0, 0, 1, 1], [], []>} : vector<8x64xbf16>, vector<64x192xbf16>, vector<8x192xf32> -> vector<8x192xf32>
    %76 = arith.addf %75, %12 : vector<8x192xf32>
    %c8 = arith.constant 8 : index
    %c0_24 = arith.constant 0 : index
    %77 = vector.load %arg9[%c8, %c0_24] : memref<64x192xf32, #tpu.memory_space<vmem>>, vector<8x192xf32>
    %c48 = arith.constant 48 : index
    %c0_25 = arith.constant 0 : index
    %78 = vector.load %arg9[%c48, %c0_25] : memref<64x192xf32, #tpu.memory_space<vmem>>, vector<8x192xf32>
    %79 = vector.extract_strided_slice %73 {offsets = [0, 0], sizes = [8, 32], strides = [1, 1]} : vector<8x64xf32> to vector<8x32xf32>
    %80 = vector.extract_strided_slice %73 {offsets = [0, 32], sizes = [8, 32], strides = [1, 1]} : vector<8x64xf32> to vector<8x32xf32>
    %81 = vector.extract_strided_slice %77 {offsets = [0, 0], sizes = [8, 32], strides = [1, 1]} : vector<8x192xf32> to vector<8x32xf32>
    %82 = vector.extract_strided_slice %76 {offsets = [0, 0], sizes = [8, 32], strides = [1, 1]} : vector<8x192xf32> to vector<8x32xf32>
    %83 = arith.addf %81, %82 : vector<8x32xf32>
    %84 = arith.negf %83 : vector<8x32xf32>
    %85 = math.exp %84 : vector<8x32xf32>
    %cst_26 = arith.constant 1.000000e+00 : f32
    %86 = vector.broadcast %cst_26 : f32 to vector<8x32xf32>
    %87 = arith.addf %86, %85 : vector<8x32xf32>
    %88 = arith.divf %86, %87 : vector<8x32xf32>
    %89 = vector.extract_strided_slice %77 {offsets = [0, 32], sizes = [8, 32], strides = [1, 1]} : vector<8x192xf32> to vector<8x32xf32>
    %90 = vector.extract_strided_slice %76 {offsets = [0, 32], sizes = [8, 32], strides = [1, 1]} : vector<8x192xf32> to vector<8x32xf32>
    %91 = arith.addf %89, %90 : vector<8x32xf32>
    %92 = arith.negf %91 : vector<8x32xf32>
    %93 = math.exp %92 : vector<8x32xf32>
    %cst_27 = arith.constant 1.000000e+00 : f32
    %94 = vector.broadcast %cst_27 : f32 to vector<8x32xf32>
    %95 = arith.addf %94, %93 : vector<8x32xf32>
    %96 = arith.divf %94, %95 : vector<8x32xf32>
    %97 = vector.extract_strided_slice %77 {offsets = [0, 64], sizes = [8, 32], strides = [1, 1]} : vector<8x192xf32> to vector<8x32xf32>
    %98 = vector.extract_strided_slice %76 {offsets = [0, 64], sizes = [8, 32], strides = [1, 1]} : vector<8x192xf32> to vector<8x32xf32>
    %99 = arith.mulf %88, %98 : vector<8x32xf32>
    %100 = arith.addf %97, %99 : vector<8x32xf32>
    %101 = math.tanh %100 : vector<8x32xf32>
    %cst_28 = arith.constant 1.000000e+00 : f32
    %102 = vector.broadcast %cst_28 : f32 to vector<8x32xf32>
    %103 = arith.subf %102, %96 : vector<8x32xf32>
    %104 = arith.mulf %103, %101 : vector<8x32xf32>
    %105 = arith.mulf %96, %79 : vector<8x32xf32>
    %106 = arith.addf %104, %105 : vector<8x32xf32>
    %107 = vector.extract_strided_slice %78 {offsets = [0, 96], sizes = [8, 32], strides = [1, 1]} : vector<8x192xf32> to vector<8x32xf32>
    %108 = vector.extract_strided_slice %76 {offsets = [0, 96], sizes = [8, 32], strides = [1, 1]} : vector<8x192xf32> to vector<8x32xf32>
    %109 = arith.addf %107, %108 : vector<8x32xf32>
    %110 = arith.negf %109 : vector<8x32xf32>
    %111 = math.exp %110 : vector<8x32xf32>
    %cst_29 = arith.constant 1.000000e+00 : f32
    %112 = vector.broadcast %cst_29 : f32 to vector<8x32xf32>
    %113 = arith.addf %112, %111 : vector<8x32xf32>
    %114 = arith.divf %112, %113 : vector<8x32xf32>
    %115 = vector.extract_strided_slice %78 {offsets = [0, 128], sizes = [8, 32], strides = [1, 1]} : vector<8x192xf32> to vector<8x32xf32>
    %116 = vector.extract_strided_slice %76 {offsets = [0, 128], sizes = [8, 32], strides = [1, 1]} : vector<8x192xf32> to vector<8x32xf32>
    %117 = arith.addf %115, %116 : vector<8x32xf32>
    %118 = arith.negf %117 : vector<8x32xf32>
    %119 = math.exp %118 : vector<8x32xf32>
    %cst_30 = arith.constant 1.000000e+00 : f32
    %120 = vector.broadcast %cst_30 : f32 to vector<8x32xf32>
    %121 = arith.addf %120, %119 : vector<8x32xf32>
    %122 = arith.divf %120, %121 : vector<8x32xf32>
    %123 = vector.extract_strided_slice %78 {offsets = [0, 160], sizes = [8, 32], strides = [1, 1]} : vector<8x192xf32> to vector<8x32xf32>
    %124 = vector.extract_strided_slice %76 {offsets = [0, 160], sizes = [8, 32], strides = [1, 1]} : vector<8x192xf32> to vector<8x32xf32>
    %125 = arith.mulf %114, %124 : vector<8x32xf32>
    %126 = arith.addf %123, %125 : vector<8x32xf32>
    %127 = math.tanh %126 : vector<8x32xf32>
    %cst_31 = arith.constant 1.000000e+00 : f32
    %128 = vector.broadcast %cst_31 : f32 to vector<8x32xf32>
    %129 = arith.subf %128, %122 : vector<8x32xf32>
    %130 = arith.mulf %129, %127 : vector<8x32xf32>
    %131 = arith.mulf %122, %80 : vector<8x32xf32>
    %132 = arith.addf %130, %131 : vector<8x32xf32>
    %133 = tpu.concatenate %106, %132 in 1 : vector<8x32xf32>, vector<8x32xf32> -> vector<8x64xf32>
    %134 = arith.truncf %133 : vector<8x64xf32> to vector<8x64xbf16>
    %cst_32 = arith.constant dense<0.000000e+00> : vector<8x192xf32>
    %135 = tpu.matmul %134, %9, %cst_32 {dimension_numbers = #tpu.dot_dimension_numbers<[1], [0], [0], [1], [0, 0, 1, 1], [], []>} : vector<8x64xbf16>, vector<64x192xbf16>, vector<8x192xf32> -> vector<8x192xf32>
    %136 = arith.addf %135, %12 : vector<8x192xf32>
    %c16 = arith.constant 16 : index
    %c0_33 = arith.constant 0 : index
    %137 = vector.load %arg9[%c16, %c0_33] : memref<64x192xf32, #tpu.memory_space<vmem>>, vector<8x192xf32>
    %c40 = arith.constant 40 : index
    %c0_34 = arith.constant 0 : index
    %138 = vector.load %arg9[%c40, %c0_34] : memref<64x192xf32, #tpu.memory_space<vmem>>, vector<8x192xf32>
    %139 = vector.extract_strided_slice %133 {offsets = [0, 0], sizes = [8, 32], strides = [1, 1]} : vector<8x64xf32> to vector<8x32xf32>
    %140 = vector.extract_strided_slice %133 {offsets = [0, 32], sizes = [8, 32], strides = [1, 1]} : vector<8x64xf32> to vector<8x32xf32>
    %141 = vector.extract_strided_slice %137 {offsets = [0, 0], sizes = [8, 32], strides = [1, 1]} : vector<8x192xf32> to vector<8x32xf32>
    %142 = vector.extract_strided_slice %136 {offsets = [0, 0], sizes = [8, 32], strides = [1, 1]} : vector<8x192xf32> to vector<8x32xf32>
    %143 = arith.addf %141, %142 : vector<8x32xf32>
    %144 = arith.negf %143 : vector<8x32xf32>
    %145 = math.exp %144 : vector<8x32xf32>
    %cst_35 = arith.constant 1.000000e+00 : f32
    %146 = vector.broadcast %cst_35 : f32 to vector<8x32xf32>
    %147 = arith.addf %146, %145 : vector<8x32xf32>
    %148 = arith.divf %146, %147 : vector<8x32xf32>
    %149 = vector.extract_strided_slice %137 {offsets = [0, 32], sizes = [8, 32], strides = [1, 1]} : vector<8x192xf32> to vector<8x32xf32>
    %150 = vector.extract_strided_slice %136 {offsets = [0, 32], sizes = [8, 32], strides = [1, 1]} : vector<8x192xf32> to vector<8x32xf32>
    %151 = arith.addf %149, %150 : vector<8x32xf32>
    %152 = arith.negf %151 : vector<8x32xf32>
    %153 = math.exp %152 : vector<8x32xf32>
    %cst_36 = arith.constant 1.000000e+00 : f32
    %154 = vector.broadcast %cst_36 : f32 to vector<8x32xf32>
    %155 = arith.addf %154, %153 : vector<8x32xf32>
    %156 = arith.divf %154, %155 : vector<8x32xf32>
    %157 = vector.extract_strided_slice %137 {offsets = [0, 64], sizes = [8, 32], strides = [1, 1]} : vector<8x192xf32> to vector<8x32xf32>
    %158 = vector.extract_strided_slice %136 {offsets = [0, 64], sizes = [8, 32], strides = [1, 1]} : vector<8x192xf32> to vector<8x32xf32>
    %159 = arith.mulf %148, %158 : vector<8x32xf32>
    %160 = arith.addf %157, %159 : vector<8x32xf32>
    %161 = math.tanh %160 : vector<8x32xf32>
    %cst_37 = arith.constant 1.000000e+00 : f32
    %162 = vector.broadcast %cst_37 : f32 to vector<8x32xf32>
    %163 = arith.subf %162, %156 : vector<8x32xf32>
    %164 = arith.mulf %163, %161 : vector<8x32xf32>
    %165 = arith.mulf %156, %139 : vector<8x32xf32>
    %166 = arith.addf %164, %165 : vector<8x32xf32>
    %167 = vector.extract_strided_slice %138 {offsets = [0, 96], sizes = [8, 32], strides = [1, 1]} : vector<8x192xf32> to vector<8x32xf32>
    %168 = vector.extract_strided_slice %136 {offsets = [0, 96], sizes = [8, 32], strides = [1, 1]} : vector<8x192xf32> to vector<8x32xf32>
    %169 = arith.addf %167, %168 : vector<8x32xf32>
    %170 = arith.negf %169 : vector<8x32xf32>
    %171 = math.exp %170 : vector<8x32xf32>
    %cst_38 = arith.constant 1.000000e+00 : f32
    %172 = vector.broadcast %cst_38 : f32 to vector<8x32xf32>
    %173 = arith.addf %172, %171 : vector<8x32xf32>
    %174 = arith.divf %172, %173 : vector<8x32xf32>
    %175 = vector.extract_strided_slice %138 {offsets = [0, 128], sizes = [8, 32], strides = [1, 1]} : vector<8x192xf32> to vector<8x32xf32>
    %176 = vector.extract_strided_slice %136 {offsets = [0, 128], sizes = [8, 32], strides = [1, 1]} : vector<8x192xf32> to vector<8x32xf32>
    %177 = arith.addf %175, %176 : vector<8x32xf32>
    %178 = arith.negf %177 : vector<8x32xf32>
    %179 = math.exp %178 : vector<8x32xf32>
    %cst_39 = arith.constant 1.000000e+00 : f32
    %180 = vector.broadcast %cst_39 : f32 to vector<8x32xf32>
    %181 = arith.addf %180, %179 : vector<8x32xf32>
    %182 = arith.divf %180, %181 : vector<8x32xf32>
    %183 = vector.extract_strided_slice %138 {offsets = [0, 160], sizes = [8, 32], strides = [1, 1]} : vector<8x192xf32> to vector<8x32xf32>
    %184 = vector.extract_strided_slice %136 {offsets = [0, 160], sizes = [8, 32], strides = [1, 1]} : vector<8x192xf32> to vector<8x32xf32>
    %185 = arith.mulf %174, %184 : vector<8x32xf32>
    %186 = arith.addf %183, %185 : vector<8x32xf32>
    %187 = math.tanh %186 : vector<8x32xf32>
    %cst_40 = arith.constant 1.000000e+00 : f32
    %188 = vector.broadcast %cst_40 : f32 to vector<8x32xf32>
    %189 = arith.subf %188, %182 : vector<8x32xf32>
    %190 = arith.mulf %189, %187 : vector<8x32xf32>
    %191 = arith.mulf %182, %140 : vector<8x32xf32>
    %192 = arith.addf %190, %191 : vector<8x32xf32>
    %193 = tpu.concatenate %166, %192 in 1 : vector<8x32xf32>, vector<8x32xf32> -> vector<8x64xf32>
    %194 = arith.truncf %193 : vector<8x64xf32> to vector<8x64xbf16>
    %cst_41 = arith.constant dense<0.000000e+00> : vector<8x192xf32>
    %195 = tpu.matmul %194, %9, %cst_41 {dimension_numbers = #tpu.dot_dimension_numbers<[1], [0], [0], [1], [0, 0, 1, 1], [], []>} : vector<8x64xbf16>, vector<64x192xbf16>, vector<8x192xf32> -> vector<8x192xf32>
    %196 = arith.addf %195, %12 : vector<8x192xf32>
    %c24 = arith.constant 24 : index
    %c0_42 = arith.constant 0 : index
    %197 = vector.load %arg9[%c24, %c0_42] : memref<64x192xf32, #tpu.memory_space<vmem>>, vector<8x192xf32>
    %c32 = arith.constant 32 : index
    %c0_43 = arith.constant 0 : index
    %198 = vector.load %arg9[%c32, %c0_43] : memref<64x192xf32, #tpu.memory_space<vmem>>, vector<8x192xf32>
    %199 = vector.extract_strided_slice %193 {offsets = [0, 0], sizes = [8, 32], strides = [1, 1]} : vector<8x64xf32> to vector<8x32xf32>
    %200 = vector.extract_strided_slice %193 {offsets = [0, 32], sizes = [8, 32], strides = [1, 1]} : vector<8x64xf32> to vector<8x32xf32>
    %201 = vector.extract_strided_slice %197 {offsets = [0, 0], sizes = [8, 32], strides = [1, 1]} : vector<8x192xf32> to vector<8x32xf32>
    %202 = vector.extract_strided_slice %196 {offsets = [0, 0], sizes = [8, 32], strides = [1, 1]} : vector<8x192xf32> to vector<8x32xf32>
    %203 = arith.addf %201, %202 : vector<8x32xf32>
    %204 = arith.negf %203 : vector<8x32xf32>
    %205 = math.exp %204 : vector<8x32xf32>
    %cst_44 = arith.constant 1.000000e+00 : f32
    %206 = vector.broadcast %cst_44 : f32 to vector<8x32xf32>
    %207 = arith.addf %206, %205 : vector<8x32xf32>
    %208 = arith.divf %206, %207 : vector<8x32xf32>
    %209 = vector.extract_strided_slice %197 {offsets = [0, 32], sizes = [8, 32], strides = [1, 1]} : vector<8x192xf32> to vector<8x32xf32>
    %210 = vector.extract_strided_slice %196 {offsets = [0, 32], sizes = [8, 32], strides = [1, 1]} : vector<8x192xf32> to vector<8x32xf32>
    %211 = arith.addf %209, %210 : vector<8x32xf32>
    %212 = arith.negf %211 : vector<8x32xf32>
    %213 = math.exp %212 : vector<8x32xf32>
    %cst_45 = arith.constant 1.000000e+00 : f32
    %214 = vector.broadcast %cst_45 : f32 to vector<8x32xf32>
    %215 = arith.addf %214, %213 : vector<8x32xf32>
    %216 = arith.divf %214, %215 : vector<8x32xf32>
    %217 = vector.extract_strided_slice %197 {offsets = [0, 64], sizes = [8, 32], strides = [1, 1]} : vector<8x192xf32> to vector<8x32xf32>
    %218 = vector.extract_strided_slice %196 {offsets = [0, 64], sizes = [8, 32], strides = [1, 1]} : vector<8x192xf32> to vector<8x32xf32>
    %219 = arith.mulf %208, %218 : vector<8x32xf32>
    %220 = arith.addf %217, %219 : vector<8x32xf32>
    %221 = math.tanh %220 : vector<8x32xf32>
    %cst_46 = arith.constant 1.000000e+00 : f32
    %222 = vector.broadcast %cst_46 : f32 to vector<8x32xf32>
    %223 = arith.subf %222, %216 : vector<8x32xf32>
    %224 = arith.mulf %223, %221 : vector<8x32xf32>
    %225 = arith.mulf %216, %199 : vector<8x32xf32>
    %226 = arith.addf %224, %225 : vector<8x32xf32>
    %227 = vector.extract_strided_slice %198 {offsets = [0, 96], sizes = [8, 32], strides = [1, 1]} : vector<8x192xf32> to vector<8x32xf32>
    %228 = vector.extract_strided_slice %196 {offsets = [0, 96], sizes = [8, 32], strides = [1, 1]} : vector<8x192xf32> to vector<8x32xf32>
    %229 = arith.addf %227, %228 : vector<8x32xf32>
    %230 = arith.negf %229 : vector<8x32xf32>
    %231 = math.exp %230 : vector<8x32xf32>
    %cst_47 = arith.constant 1.000000e+00 : f32
    %232 = vector.broadcast %cst_47 : f32 to vector<8x32xf32>
    %233 = arith.addf %232, %231 : vector<8x32xf32>
    %234 = arith.divf %232, %233 : vector<8x32xf32>
    %235 = vector.extract_strided_slice %198 {offsets = [0, 128], sizes = [8, 32], strides = [1, 1]} : vector<8x192xf32> to vector<8x32xf32>
    %236 = vector.extract_strided_slice %196 {offsets = [0, 128], sizes = [8, 32], strides = [1, 1]} : vector<8x192xf32> to vector<8x32xf32>
    %237 = arith.addf %235, %236 : vector<8x32xf32>
    %238 = arith.negf %237 : vector<8x32xf32>
    %239 = math.exp %238 : vector<8x32xf32>
    %cst_48 = arith.constant 1.000000e+00 : f32
    %240 = vector.broadcast %cst_48 : f32 to vector<8x32xf32>
    %241 = arith.addf %240, %239 : vector<8x32xf32>
    %242 = arith.divf %240, %241 : vector<8x32xf32>
    %243 = vector.extract_strided_slice %198 {offsets = [0, 160], sizes = [8, 32], strides = [1, 1]} : vector<8x192xf32> to vector<8x32xf32>
    %244 = vector.extract_strided_slice %196 {offsets = [0, 160], sizes = [8, 32], strides = [1, 1]} : vector<8x192xf32> to vector<8x32xf32>
    %245 = arith.mulf %234, %244 : vector<8x32xf32>
    %246 = arith.addf %243, %245 : vector<8x32xf32>
    %247 = math.tanh %246 : vector<8x32xf32>
    %cst_49 = arith.constant 1.000000e+00 : f32
    %248 = vector.broadcast %cst_49 : f32 to vector<8x32xf32>
    %249 = arith.subf %248, %242 : vector<8x32xf32>
    %250 = arith.mulf %249, %247 : vector<8x32xf32>
    %251 = arith.mulf %242, %200 : vector<8x32xf32>
    %252 = arith.addf %250, %251 : vector<8x32xf32>
    %253 = tpu.concatenate %226, %252 in 1 : vector<8x32xf32>, vector<8x32xf32> -> vector<8x64xf32>
    %254 = arith.truncf %253 : vector<8x64xf32> to vector<8x64xbf16>
    %cst_50 = arith.constant dense<0.000000e+00> : vector<8x192xf32>
    %255 = tpu.matmul %254, %9, %cst_50 {dimension_numbers = #tpu.dot_dimension_numbers<[1], [0], [0], [1], [0, 0, 1, 1], [], []>} : vector<8x64xbf16>, vector<64x192xbf16>, vector<8x192xf32> -> vector<8x192xf32>
    %256 = arith.addf %255, %12 : vector<8x192xf32>
    %c32_51 = arith.constant 32 : index
    %c0_52 = arith.constant 0 : index
    %257 = vector.load %arg9[%c32_51, %c0_52] : memref<64x192xf32, #tpu.memory_space<vmem>>, vector<8x192xf32>
    %c24_53 = arith.constant 24 : index
    %c0_54 = arith.constant 0 : index
    %258 = vector.load %arg9[%c24_53, %c0_54] : memref<64x192xf32, #tpu.memory_space<vmem>>, vector<8x192xf32>
    %259 = vector.extract_strided_slice %253 {offsets = [0, 0], sizes = [8, 32], strides = [1, 1]} : vector<8x64xf32> to vector<8x32xf32>
    %260 = vector.extract_strided_slice %253 {offsets = [0, 32], sizes = [8, 32], strides = [1, 1]} : vector<8x64xf32> to vector<8x32xf32>
    %261 = vector.extract_strided_slice %257 {offsets = [0, 0], sizes = [8, 32], strides = [1, 1]} : vector<8x192xf32> to vector<8x32xf32>
    %262 = vector.extract_strided_slice %256 {offsets = [0, 0], sizes = [8, 32], strides = [1, 1]} : vector<8x192xf32> to vector<8x32xf32>
    %263 = arith.addf %261, %262 : vector<8x32xf32>
    %264 = arith.negf %263 : vector<8x32xf32>
    %265 = math.exp %264 : vector<8x32xf32>
    %cst_55 = arith.constant 1.000000e+00 : f32
    %266 = vector.broadcast %cst_55 : f32 to vector<8x32xf32>
    %267 = arith.addf %266, %265 : vector<8x32xf32>
    %268 = arith.divf %266, %267 : vector<8x32xf32>
    %269 = vector.extract_strided_slice %257 {offsets = [0, 32], sizes = [8, 32], strides = [1, 1]} : vector<8x192xf32> to vector<8x32xf32>
    %270 = vector.extract_strided_slice %256 {offsets = [0, 32], sizes = [8, 32], strides = [1, 1]} : vector<8x192xf32> to vector<8x32xf32>
    %271 = arith.addf %269, %270 : vector<8x32xf32>
    %272 = arith.negf %271 : vector<8x32xf32>
    %273 = math.exp %272 : vector<8x32xf32>
    %cst_56 = arith.constant 1.000000e+00 : f32
    %274 = vector.broadcast %cst_56 : f32 to vector<8x32xf32>
    %275 = arith.addf %274, %273 : vector<8x32xf32>
    %276 = arith.divf %274, %275 : vector<8x32xf32>
    %277 = vector.extract_strided_slice %257 {offsets = [0, 64], sizes = [8, 32], strides = [1, 1]} : vector<8x192xf32> to vector<8x32xf32>
    %278 = vector.extract_strided_slice %256 {offsets = [0, 64], sizes = [8, 32], strides = [1, 1]} : vector<8x192xf32> to vector<8x32xf32>
    %279 = arith.mulf %268, %278 : vector<8x32xf32>
    %280 = arith.addf %277, %279 : vector<8x32xf32>
    %281 = math.tanh %280 : vector<8x32xf32>
    %cst_57 = arith.constant 1.000000e+00 : f32
    %282 = vector.broadcast %cst_57 : f32 to vector<8x32xf32>
    %283 = arith.subf %282, %276 : vector<8x32xf32>
    %284 = arith.mulf %283, %281 : vector<8x32xf32>
    %285 = arith.mulf %276, %259 : vector<8x32xf32>
    %286 = arith.addf %284, %285 : vector<8x32xf32>
    %287 = vector.extract_strided_slice %258 {offsets = [0, 96], sizes = [8, 32], strides = [1, 1]} : vector<8x192xf32> to vector<8x32xf32>
    %288 = vector.extract_strided_slice %256 {offsets = [0, 96], sizes = [8, 32], strides = [1, 1]} : vector<8x192xf32> to vector<8x32xf32>
    %289 = arith.addf %287, %288 : vector<8x32xf32>
    %290 = arith.negf %289 : vector<8x32xf32>
    %291 = math.exp %290 : vector<8x32xf32>
    %cst_58 = arith.constant 1.000000e+00 : f32
    %292 = vector.broadcast %cst_58 : f32 to vector<8x32xf32>
    %293 = arith.addf %292, %291 : vector<8x32xf32>
    %294 = arith.divf %292, %293 : vector<8x32xf32>
    %295 = vector.extract_strided_slice %258 {offsets = [0, 128], sizes = [8, 32], strides = [1, 1]} : vector<8x192xf32> to vector<8x32xf32>
    %296 = vector.extract_strided_slice %256 {offsets = [0, 128], sizes = [8, 32], strides = [1, 1]} : vector<8x192xf32> to vector<8x32xf32>
    %297 = arith.addf %295, %296 : vector<8x32xf32>
    %298 = arith.negf %297 : vector<8x32xf32>
    %299 = math.exp %298 : vector<8x32xf32>
    %cst_59 = arith.constant 1.000000e+00 : f32
    %300 = vector.broadcast %cst_59 : f32 to vector<8x32xf32>
    %301 = arith.addf %300, %299 : vector<8x32xf32>
    %302 = arith.divf %300, %301 : vector<8x32xf32>
    %303 = vector.extract_strided_slice %258 {offsets = [0, 160], sizes = [8, 32], strides = [1, 1]} : vector<8x192xf32> to vector<8x32xf32>
    %304 = vector.extract_strided_slice %256 {offsets = [0, 160], sizes = [8, 32], strides = [1, 1]} : vector<8x192xf32> to vector<8x32xf32>
    %305 = arith.mulf %294, %304 : vector<8x32xf32>
    %306 = arith.addf %303, %305 : vector<8x32xf32>
    %307 = math.tanh %306 : vector<8x32xf32>
    %cst_60 = arith.constant 1.000000e+00 : f32
    %308 = vector.broadcast %cst_60 : f32 to vector<8x32xf32>
    %309 = arith.subf %308, %302 : vector<8x32xf32>
    %310 = arith.mulf %309, %307 : vector<8x32xf32>
    %311 = arith.mulf %302, %260 : vector<8x32xf32>
    %312 = arith.addf %310, %311 : vector<8x32xf32>
    %313 = tpu.concatenate %286, %312 in 1 : vector<8x32xf32>, vector<8x32xf32> -> vector<8x64xf32>
    %314 = arith.truncf %313 : vector<8x64xf32> to vector<8x64xbf16>
    %cst_61 = arith.constant dense<0.000000e+00> : vector<8x192xf32>
    %315 = tpu.matmul %314, %9, %cst_61 {dimension_numbers = #tpu.dot_dimension_numbers<[1], [0], [0], [1], [0, 0, 1, 1], [], []>} : vector<8x64xbf16>, vector<64x192xbf16>, vector<8x192xf32> -> vector<8x192xf32>
    %316 = arith.addf %315, %12 : vector<8x192xf32>
    %c40_62 = arith.constant 40 : index
    %c0_63 = arith.constant 0 : index
    %317 = vector.load %arg9[%c40_62, %c0_63] : memref<64x192xf32, #tpu.memory_space<vmem>>, vector<8x192xf32>
    %c16_64 = arith.constant 16 : index
    %c0_65 = arith.constant 0 : index
    %318 = vector.load %arg9[%c16_64, %c0_65] : memref<64x192xf32, #tpu.memory_space<vmem>>, vector<8x192xf32>
    %319 = vector.extract_strided_slice %313 {offsets = [0, 0], sizes = [8, 32], strides = [1, 1]} : vector<8x64xf32> to vector<8x32xf32>
    %320 = vector.extract_strided_slice %313 {offsets = [0, 32], sizes = [8, 32], strides = [1, 1]} : vector<8x64xf32> to vector<8x32xf32>
    %321 = vector.extract_strided_slice %317 {offsets = [0, 0], sizes = [8, 32], strides = [1, 1]} : vector<8x192xf32> to vector<8x32xf32>
    %322 = vector.extract_strided_slice %316 {offsets = [0, 0], sizes = [8, 32], strides = [1, 1]} : vector<8x192xf32> to vector<8x32xf32>
    %323 = arith.addf %321, %322 : vector<8x32xf32>
    %324 = arith.negf %323 : vector<8x32xf32>
    %325 = math.exp %324 : vector<8x32xf32>
    %cst_66 = arith.constant 1.000000e+00 : f32
    %326 = vector.broadcast %cst_66 : f32 to vector<8x32xf32>
    %327 = arith.addf %326, %325 : vector<8x32xf32>
    %328 = arith.divf %326, %327 : vector<8x32xf32>
    %329 = vector.extract_strided_slice %317 {offsets = [0, 32], sizes = [8, 32], strides = [1, 1]} : vector<8x192xf32> to vector<8x32xf32>
    %330 = vector.extract_strided_slice %316 {offsets = [0, 32], sizes = [8, 32], strides = [1, 1]} : vector<8x192xf32> to vector<8x32xf32>
    %331 = arith.addf %329, %330 : vector<8x32xf32>
    %332 = arith.negf %331 : vector<8x32xf32>
    %333 = math.exp %332 : vector<8x32xf32>
    %cst_67 = arith.constant 1.000000e+00 : f32
    %334 = vector.broadcast %cst_67 : f32 to vector<8x32xf32>
    %335 = arith.addf %334, %333 : vector<8x32xf32>
    %336 = arith.divf %334, %335 : vector<8x32xf32>
    %337 = vector.extract_strided_slice %317 {offsets = [0, 64], sizes = [8, 32], strides = [1, 1]} : vector<8x192xf32> to vector<8x32xf32>
    %338 = vector.extract_strided_slice %316 {offsets = [0, 64], sizes = [8, 32], strides = [1, 1]} : vector<8x192xf32> to vector<8x32xf32>
    %339 = arith.mulf %328, %338 : vector<8x32xf32>
    %340 = arith.addf %337, %339 : vector<8x32xf32>
    %341 = math.tanh %340 : vector<8x32xf32>
    %cst_68 = arith.constant 1.000000e+00 : f32
    %342 = vector.broadcast %cst_68 : f32 to vector<8x32xf32>
    %343 = arith.subf %342, %336 : vector<8x32xf32>
    %344 = arith.mulf %343, %341 : vector<8x32xf32>
    %345 = arith.mulf %336, %319 : vector<8x32xf32>
    %346 = arith.addf %344, %345 : vector<8x32xf32>
    %347 = vector.extract_strided_slice %318 {offsets = [0, 96], sizes = [8, 32], strides = [1, 1]} : vector<8x192xf32> to vector<8x32xf32>
    %348 = vector.extract_strided_slice %316 {offsets = [0, 96], sizes = [8, 32], strides = [1, 1]} : vector<8x192xf32> to vector<8x32xf32>
    %349 = arith.addf %347, %348 : vector<8x32xf32>
    %350 = arith.negf %349 : vector<8x32xf32>
    %351 = math.exp %350 : vector<8x32xf32>
    %cst_69 = arith.constant 1.000000e+00 : f32
    %352 = vector.broadcast %cst_69 : f32 to vector<8x32xf32>
    %353 = arith.addf %352, %351 : vector<8x32xf32>
    %354 = arith.divf %352, %353 : vector<8x32xf32>
    %355 = vector.extract_strided_slice %318 {offsets = [0, 128], sizes = [8, 32], strides = [1, 1]} : vector<8x192xf32> to vector<8x32xf32>
    %356 = vector.extract_strided_slice %316 {offsets = [0, 128], sizes = [8, 32], strides = [1, 1]} : vector<8x192xf32> to vector<8x32xf32>
    %357 = arith.addf %355, %356 : vector<8x32xf32>
    %358 = arith.negf %357 : vector<8x32xf32>
    %359 = math.exp %358 : vector<8x32xf32>
    %cst_70 = arith.constant 1.000000e+00 : f32
    %360 = vector.broadcast %cst_70 : f32 to vector<8x32xf32>
    %361 = arith.addf %360, %359 : vector<8x32xf32>
    %362 = arith.divf %360, %361 : vector<8x32xf32>
    %363 = vector.extract_strided_slice %318 {offsets = [0, 160], sizes = [8, 32], strides = [1, 1]} : vector<8x192xf32> to vector<8x32xf32>
    %364 = vector.extract_strided_slice %316 {offsets = [0, 160], sizes = [8, 32], strides = [1, 1]} : vector<8x192xf32> to vector<8x32xf32>
    %365 = arith.mulf %354, %364 : vector<8x32xf32>
    %366 = arith.addf %363, %365 : vector<8x32xf32>
    %367 = math.tanh %366 : vector<8x32xf32>
    %cst_71 = arith.constant 1.000000e+00 : f32
    %368 = vector.broadcast %cst_71 : f32 to vector<8x32xf32>
    %369 = arith.subf %368, %362 : vector<8x32xf32>
    %370 = arith.mulf %369, %367 : vector<8x32xf32>
    %371 = arith.mulf %362, %320 : vector<8x32xf32>
    %372 = arith.addf %370, %371 : vector<8x32xf32>
    %373 = tpu.concatenate %346, %372 in 1 : vector<8x32xf32>, vector<8x32xf32> -> vector<8x64xf32>
    %374 = arith.truncf %373 : vector<8x64xf32> to vector<8x64xbf16>
    %cst_72 = arith.constant dense<0.000000e+00> : vector<8x192xf32>
    %375 = tpu.matmul %374, %9, %cst_72 {dimension_numbers = #tpu.dot_dimension_numbers<[1], [0], [0], [1], [0, 0, 1, 1], [], []>} : vector<8x64xbf16>, vector<64x192xbf16>, vector<8x192xf32> -> vector<8x192xf32>
    %376 = arith.addf %375, %12 : vector<8x192xf32>
    %c48_73 = arith.constant 48 : index
    %c0_74 = arith.constant 0 : index
    %377 = vector.load %arg9[%c48_73, %c0_74] : memref<64x192xf32, #tpu.memory_space<vmem>>, vector<8x192xf32>
    %c8_75 = arith.constant 8 : index
    %c0_76 = arith.constant 0 : index
    %378 = vector.load %arg9[%c8_75, %c0_76] : memref<64x192xf32, #tpu.memory_space<vmem>>, vector<8x192xf32>
    %379 = vector.extract_strided_slice %373 {offsets = [0, 0], sizes = [8, 32], strides = [1, 1]} : vector<8x64xf32> to vector<8x32xf32>
    %380 = vector.extract_strided_slice %373 {offsets = [0, 32], sizes = [8, 32], strides = [1, 1]} : vector<8x64xf32> to vector<8x32xf32>
    %381 = vector.extract_strided_slice %377 {offsets = [0, 0], sizes = [8, 32], strides = [1, 1]} : vector<8x192xf32> to vector<8x32xf32>
    %382 = vector.extract_strided_slice %376 {offsets = [0, 0], sizes = [8, 32], strides = [1, 1]} : vector<8x192xf32> to vector<8x32xf32>
    %383 = arith.addf %381, %382 : vector<8x32xf32>
    %384 = arith.negf %383 : vector<8x32xf32>
    %385 = math.exp %384 : vector<8x32xf32>
    %cst_77 = arith.constant 1.000000e+00 : f32
    %386 = vector.broadcast %cst_77 : f32 to vector<8x32xf32>
    %387 = arith.addf %386, %385 : vector<8x32xf32>
    %388 = arith.divf %386, %387 : vector<8x32xf32>
    %389 = vector.extract_strided_slice %377 {offsets = [0, 32], sizes = [8, 32], strides = [1, 1]} : vector<8x192xf32> to vector<8x32xf32>
    %390 = vector.extract_strided_slice %376 {offsets = [0, 32], sizes = [8, 32], strides = [1, 1]} : vector<8x192xf32> to vector<8x32xf32>
    %391 = arith.addf %389, %390 : vector<8x32xf32>
    %392 = arith.negf %391 : vector<8x32xf32>
    %393 = math.exp %392 : vector<8x32xf32>
    %cst_78 = arith.constant 1.000000e+00 : f32
    %394 = vector.broadcast %cst_78 : f32 to vector<8x32xf32>
    %395 = arith.addf %394, %393 : vector<8x32xf32>
    %396 = arith.divf %394, %395 : vector<8x32xf32>
    %397 = vector.extract_strided_slice %377 {offsets = [0, 64], sizes = [8, 32], strides = [1, 1]} : vector<8x192xf32> to vector<8x32xf32>
    %398 = vector.extract_strided_slice %376 {offsets = [0, 64], sizes = [8, 32], strides = [1, 1]} : vector<8x192xf32> to vector<8x32xf32>
    %399 = arith.mulf %388, %398 : vector<8x32xf32>
    %400 = arith.addf %397, %399 : vector<8x32xf32>
    %401 = math.tanh %400 : vector<8x32xf32>
    %cst_79 = arith.constant 1.000000e+00 : f32
    %402 = vector.broadcast %cst_79 : f32 to vector<8x32xf32>
    %403 = arith.subf %402, %396 : vector<8x32xf32>
    %404 = arith.mulf %403, %401 : vector<8x32xf32>
    %405 = arith.mulf %396, %379 : vector<8x32xf32>
    %406 = arith.addf %404, %405 : vector<8x32xf32>
    %407 = vector.extract_strided_slice %378 {offsets = [0, 96], sizes = [8, 32], strides = [1, 1]} : vector<8x192xf32> to vector<8x32xf32>
    %408 = vector.extract_strided_slice %376 {offsets = [0, 96], sizes = [8, 32], strides = [1, 1]} : vector<8x192xf32> to vector<8x32xf32>
    %409 = arith.addf %407, %408 : vector<8x32xf32>
    %410 = arith.negf %409 : vector<8x32xf32>
    %411 = math.exp %410 : vector<8x32xf32>
    %cst_80 = arith.constant 1.000000e+00 : f32
    %412 = vector.broadcast %cst_80 : f32 to vector<8x32xf32>
    %413 = arith.addf %412, %411 : vector<8x32xf32>
    %414 = arith.divf %412, %413 : vector<8x32xf32>
    %415 = vector.extract_strided_slice %378 {offsets = [0, 128], sizes = [8, 32], strides = [1, 1]} : vector<8x192xf32> to vector<8x32xf32>
    %416 = vector.extract_strided_slice %376 {offsets = [0, 128], sizes = [8, 32], strides = [1, 1]} : vector<8x192xf32> to vector<8x32xf32>
    %417 = arith.addf %415, %416 : vector<8x32xf32>
    %418 = arith.negf %417 : vector<8x32xf32>
    %419 = math.exp %418 : vector<8x32xf32>
    %cst_81 = arith.constant 1.000000e+00 : f32
    %420 = vector.broadcast %cst_81 : f32 to vector<8x32xf32>
    %421 = arith.addf %420, %419 : vector<8x32xf32>
    %422 = arith.divf %420, %421 : vector<8x32xf32>
    %423 = vector.extract_strided_slice %378 {offsets = [0, 160], sizes = [8, 32], strides = [1, 1]} : vector<8x192xf32> to vector<8x32xf32>
    %424 = vector.extract_strided_slice %376 {offsets = [0, 160], sizes = [8, 32], strides = [1, 1]} : vector<8x192xf32> to vector<8x32xf32>
    %425 = arith.mulf %414, %424 : vector<8x32xf32>
    %426 = arith.addf %423, %425 : vector<8x32xf32>
    %427 = math.tanh %426 : vector<8x32xf32>
    %cst_82 = arith.constant 1.000000e+00 : f32
    %428 = vector.broadcast %cst_82 : f32 to vector<8x32xf32>
    %429 = arith.subf %428, %422 : vector<8x32xf32>
    %430 = arith.mulf %429, %427 : vector<8x32xf32>
    %431 = arith.mulf %422, %380 : vector<8x32xf32>
    %432 = arith.addf %430, %431 : vector<8x32xf32>
    %433 = tpu.concatenate %406, %432 in 1 : vector<8x32xf32>, vector<8x32xf32> -> vector<8x64xf32>
    %434 = arith.truncf %433 : vector<8x64xf32> to vector<8x64xbf16>
    %cst_83 = arith.constant dense<0.000000e+00> : vector<8x192xf32>
    %435 = tpu.matmul %434, %9, %cst_83 {dimension_numbers = #tpu.dot_dimension_numbers<[1], [0], [0], [1], [0, 0, 1, 1], [], []>} : vector<8x64xbf16>, vector<64x192xbf16>, vector<8x192xf32> -> vector<8x192xf32>
    %436 = arith.addf %435, %12 : vector<8x192xf32>
    %c56_84 = arith.constant 56 : index
    %c0_85 = arith.constant 0 : index
    %437 = vector.load %arg9[%c56_84, %c0_85] : memref<64x192xf32, #tpu.memory_space<vmem>>, vector<8x192xf32>
    %c0_86 = arith.constant 0 : index
    %c0_87 = arith.constant 0 : index
    %438 = vector.load %arg9[%c0_86, %c0_87] : memref<64x192xf32, #tpu.memory_space<vmem>>, vector<8x192xf32>
    %439 = vector.extract_strided_slice %433 {offsets = [0, 0], sizes = [8, 32], strides = [1, 1]} : vector<8x64xf32> to vector<8x32xf32>
    %440 = vector.extract_strided_slice %433 {offsets = [0, 32], sizes = [8, 32], strides = [1, 1]} : vector<8x64xf32> to vector<8x32xf32>
    %441 = vector.extract_strided_slice %437 {offsets = [0, 0], sizes = [8, 32], strides = [1, 1]} : vector<8x192xf32> to vector<8x32xf32>
    %442 = vector.extract_strided_slice %436 {offsets = [0, 0], sizes = [8, 32], strides = [1, 1]} : vector<8x192xf32> to vector<8x32xf32>
    %443 = arith.addf %441, %442 : vector<8x32xf32>
    %444 = arith.negf %443 : vector<8x32xf32>
    %445 = math.exp %444 : vector<8x32xf32>
    %cst_88 = arith.constant 1.000000e+00 : f32
    %446 = vector.broadcast %cst_88 : f32 to vector<8x32xf32>
    %447 = arith.addf %446, %445 : vector<8x32xf32>
    %448 = arith.divf %446, %447 : vector<8x32xf32>
    %449 = vector.extract_strided_slice %437 {offsets = [0, 32], sizes = [8, 32], strides = [1, 1]} : vector<8x192xf32> to vector<8x32xf32>
    %450 = vector.extract_strided_slice %436 {offsets = [0, 32], sizes = [8, 32], strides = [1, 1]} : vector<8x192xf32> to vector<8x32xf32>
    %451 = arith.addf %449, %450 : vector<8x32xf32>
    %452 = arith.negf %451 : vector<8x32xf32>
    %453 = math.exp %452 : vector<8x32xf32>
    %cst_89 = arith.constant 1.000000e+00 : f32
    %454 = vector.broadcast %cst_89 : f32 to vector<8x32xf32>
    %455 = arith.addf %454, %453 : vector<8x32xf32>
    %456 = arith.divf %454, %455 : vector<8x32xf32>
    %457 = vector.extract_strided_slice %437 {offsets = [0, 64], sizes = [8, 32], strides = [1, 1]} : vector<8x192xf32> to vector<8x32xf32>
    %458 = vector.extract_strided_slice %436 {offsets = [0, 64], sizes = [8, 32], strides = [1, 1]} : vector<8x192xf32> to vector<8x32xf32>
    %459 = arith.mulf %448, %458 : vector<8x32xf32>
    %460 = arith.addf %457, %459 : vector<8x32xf32>
    %461 = math.tanh %460 : vector<8x32xf32>
    %cst_90 = arith.constant 1.000000e+00 : f32
    %462 = vector.broadcast %cst_90 : f32 to vector<8x32xf32>
    %463 = arith.subf %462, %456 : vector<8x32xf32>
    %464 = arith.mulf %463, %461 : vector<8x32xf32>
    %465 = arith.mulf %456, %439 : vector<8x32xf32>
    %466 = arith.addf %464, %465 : vector<8x32xf32>
    %467 = vector.extract_strided_slice %438 {offsets = [0, 96], sizes = [8, 32], strides = [1, 1]} : vector<8x192xf32> to vector<8x32xf32>
    %468 = vector.extract_strided_slice %436 {offsets = [0, 96], sizes = [8, 32], strides = [1, 1]} : vector<8x192xf32> to vector<8x32xf32>
    %469 = arith.addf %467, %468 : vector<8x32xf32>
    %470 = arith.negf %469 : vector<8x32xf32>
    %471 = math.exp %470 : vector<8x32xf32>
    %cst_91 = arith.constant 1.000000e+00 : f32
    %472 = vector.broadcast %cst_91 : f32 to vector<8x32xf32>
    %473 = arith.addf %472, %471 : vector<8x32xf32>
    %474 = arith.divf %472, %473 : vector<8x32xf32>
    %475 = vector.extract_strided_slice %438 {offsets = [0, 128], sizes = [8, 32], strides = [1, 1]} : vector<8x192xf32> to vector<8x32xf32>
    %476 = vector.extract_strided_slice %436 {offsets = [0, 128], sizes = [8, 32], strides = [1, 1]} : vector<8x192xf32> to vector<8x32xf32>
    %477 = arith.addf %475, %476 : vector<8x32xf32>
    %478 = arith.negf %477 : vector<8x32xf32>
    %479 = math.exp %478 : vector<8x32xf32>
    %cst_92 = arith.constant 1.000000e+00 : f32
    %480 = vector.broadcast %cst_92 : f32 to vector<8x32xf32>
    %481 = arith.addf %480, %479 : vector<8x32xf32>
    %482 = arith.divf %480, %481 : vector<8x32xf32>
    %483 = vector.extract_strided_slice %438 {offsets = [0, 160], sizes = [8, 32], strides = [1, 1]} : vector<8x192xf32> to vector<8x32xf32>
    %484 = vector.extract_strided_slice %436 {offsets = [0, 160], sizes = [8, 32], strides = [1, 1]} : vector<8x192xf32> to vector<8x32xf32>
    %485 = arith.mulf %474, %484 : vector<8x32xf32>
    %486 = arith.addf %483, %485 : vector<8x32xf32>
    %487 = math.tanh %486 : vector<8x32xf32>
    %cst_93 = arith.constant 1.000000e+00 : f32
    %488 = vector.broadcast %cst_93 : f32 to vector<8x32xf32>
    %489 = arith.subf %488, %482 : vector<8x32xf32>
    %490 = arith.mulf %489, %487 : vector<8x32xf32>
    %491 = arith.mulf %482, %440 : vector<8x32xf32>
    %492 = arith.addf %490, %491 : vector<8x32xf32>
    %493 = tpu.concatenate %466, %492 in 1 : vector<8x32xf32>, vector<8x32xf32> -> vector<8x64xf32>
    %494 = arith.truncf %493 : vector<8x64xf32> to vector<8x64xbf16>
    %c0_94 = arith.constant 0 : index
    %c0_95 = arith.constant 0 : index
    %495 = vector.load %arg6[%c0_94, %c0_95] : memref<64x128xbf16, #tpu.memory_space<vmem>>, vector<64x128xbf16>
    %cst_96 = arith.constant dense<0.000000e+00> : vector<8x128xf32>
    %496 = tpu.matmul %494, %495, %cst_96 {dimension_numbers = #tpu.dot_dimension_numbers<[1], [0], [0], [1], [0, 0, 1, 1], [], []>} : vector<8x64xbf16>, vector<64x128xbf16>, vector<8x128xf32> -> vector<8x128xf32>
    %c0_97 = arith.constant 0 : index
    %c0_98 = arith.constant 0 : index
    %497 = vector.load %arg7[%c0_97, %c0_98] : memref<1x128xf32, #tpu.memory_space<vmem>>, vector<1x128xf32>
    %498 = vector.broadcast %497 : vector<1x128xf32> to vector<8x128xf32>
    %499 = arith.addf %496, %498 : vector<8x128xf32>
    %c0_99 = arith.constant 0 : index
    %c0_100 = arith.constant 0 : index
    %500 = vector.load %arg8[%c0_99, %c0_100] : memref<8x128xf32, #tpu.memory_space<vmem>>, vector<8x128xf32>
    tpu.vector_store %arg8[%c0_99, %c0_100], %499 {strides = array<i32>} : memref<8x128xf32, #tpu.memory_space<vmem>>, vector<8x128xf32>,
    return
  }
  func.func @transform_0(%arg0: i32) -> (i32, i32, i32) {
    %c0_i32 = arith.constant 0 : i32
    %c0_i32_0 = arith.constant 0 : i32
    %c0_i32_1 = arith.constant 0 : i32
    return %c0_i32, %arg0, %c0_i32_0 : i32, i32, i32
  }
  func.func @transform_1(%arg0: i32) -> (i32, i32) {
    %c0_i32 = arith.constant 0 : i32
    %c0_i32_0 = arith.constant 0 : i32
    %c0_i32_1 = arith.constant 0 : i32
    return %c0_i32, %c0_i32_0 : i32, i32
  }
  func.func @transform_2(%arg0: i32) -> (i32, i32) {
    %c0_i32 = arith.constant 0 : i32
    %c0_i32_0 = arith.constant 0 : i32
    %c0_i32_1 = arith.constant 0 : i32
    return %c0_i32, %c0_i32_0 : i32, i32
  }
  func.func @transform_3(%arg0: i32) -> (i32, i32) {
    %c0_i32 = arith.constant 0 : i32
    %c0_i32_0 = arith.constant 0 : i32
    %c0_i32_1 = arith.constant 0 : i32
    return %c0_i32, %c0_i32_0 : i32, i32
  }
  func.func @transform_4(%arg0: i32) -> (i32, i32) {
    %c0_i32 = arith.constant 0 : i32
    %c0_i32_0 = arith.constant 0 : i32
    %c0_i32_1 = arith.constant 0 : i32
    return %c0_i32, %c0_i32_0 : i32, i32
  }
  func.func @transform_5(%arg0: i32) -> (i32, i32) {
    %c0_i32 = arith.constant 0 : i32
    %c0_i32_0 = arith.constant 0 : i32
    %c0_i32_1 = arith.constant 0 : i32
    return %c0_i32, %c0_i32_0 : i32, i32
  }
  func.func @transform_6(%arg0: i32) -> (i32, i32) {
    %c0_i32 = arith.constant 0 : i32
    %c0_i32_0 = arith.constant 0 : i32
    %c0_i32_1 = arith.constant 0 : i32
    return %c0_i32, %c0_i32_0 : i32, i32
  }
  func.func @transform_7(%arg0: i32) -> (i32, i32) {
    %c0_i32 = arith.constant 0 : i32
    %c0_i32_0 = arith.constant 0 : i32
    return %arg0, %c0_i32 : i32, i32
  }
}

</mosaic_0001>

<bundles_post_ra>
// kernel: model_forward.1
= control target key start
LH: loop header
LB: loop body
LE: loop exit
PB: predicated region body
PF: predicated region fallthrough
CT: control target
= control target key end

     0   :  { %s2168_s24 = smov 0   ;;  %s2170_s25 = smov 0   ;;  %s2649_s0 = inlined_call_operand.vmem [shape: f32[8,16,32], index: 0, kind: input, shape index: {}]   ;;  %s2650_s1 = inlined_call_operand.vmem [shape: bf16[32,192], index: 1, kind: input, shape index: {}]   ;;  %s2651_s2 = inlined_call_operand.vmem [shape: f32[1,192], index: 2, kind: input, shape index: {}]   ;;  %s2652_s3 = inlined_call_operand.vmem [shape: bf16[64,192], index: 3, kind: input, shape index: {}]   ;;  %s2653_s4 = inlined_call_operand.vmem [shape: f32[1,192], index: 4, kind: input, shape index: {}]   ;;  %s2654_s5 = inlined_call_operand.vmem [shape: bf16[64,128], index: 5, kind: input, shape index: {}]   ;;  %s2655_s6 = inlined_call_operand.vmem [shape: f32[1,128], index: 6, kind: input, shape index: {}]   ;;  %s2656_s7 = inlined_call_operand.vmem [shape: f32[16,128], index: 7, kind: output, shape index: {}]  }
   0x1   :  { %s2172_s26 = smov 0  }
   0x2 LB: > { %s1798_s27 = sadd.s32 4294967295, %s2122_s26   ;;  %s2185_s28 = sadd.s32 1, %s2122_s26   ;;  %s2122_s26 = sphi %s2172_s26, %s2659_s26   ;;  %s2118_s25 = sphi %s2170_s25, %s2658_s25   ;;  %s2114_s24 = sphi %s2168_s24, %s2657_s24  }
   0x3   : > { %s21_s29 = ssub.s32 %s2122_s26, %s2185_s28  ;;  %s24_s30 = sadd.s32 1, %s2118_s25 }
   0x4   : > { %p22_p0 = scmp.eq.s32.totalorder %s21_s29, 0  ;;  %p31_p1 = scmp.ne.s32.totalorder %s2118_s25, %s2114_s24 }
   0x5   : > { %p32_p2 = scmp.eq.s32.totalorder %s2122_s26, 0  ;;  %p1801_p4 = scmp.ge.s32.totalorder %s2122_s26, 2 }
   0x6   : > { %s2194_s8 = scalar_select %p22_p0, %s2118_s25, %s24_s30  }
   0x7   : > { %p33_p3 = por %p32_p2, %p31_p1  ;;  %227 = sbr.rel (%p1801_p4) target bundleno = 24 (0x18), region = 40 }
   0xc   : > { %230 = sbr.rel (!%p33_p3) target bundleno = 24 (0x18), region = 44  ;;  %s232_s9 = sand.u32 (%p33_p3), 1, %s2118_s25  }
   0xd   : > { %s1803_s10 = sshll.u32 (%p33_p3), %s2122_s26, 3  ;;  %s1802_s11 = sshll.u32 (%p33_p3), %s232_s9, 6 }
   0xe   : > { %s236_s14 = scalar_lea.vmem (%p33_p3), %s2649_s0, %s1803_s10  ;;  %s234_s15 = scalar_lea.vmem (%p33_p3), [#allocation3], %s1802_s11 }
   0xf   : > { %v279_v0 = vld [vmem:[%s236_s14] sm:$0xff] (%p33_p3)  ;;  %v281_v1 = vld [vmem:[%s236_s14 + $0x10] sm:$0xff] (%p33_p3) }
  0x10   : > { %v283_v2 = vld [vmem:[%s236_s14 + $0x20] sm:$0xff] (%p33_p3)  ;;  %280 = vst [vmem:[%s234_s15] sm:$0xff] (%p33_p3), %v279_v0  ;;  %v285_v3 = vld [vmem:[%s236_s14 + $0x30] sm:$0xff] (%p33_p3) }
  0x11   : > { %282 = vst [vmem:[%s234_s15 + $0x8] sm:$0xff] %v281_v1  ;;  %v287_v4 = vld [vmem:[%s236_s14 + $0x40] sm:$0xff]  ;;  %v289_v5 = vld [vmem:[%s236_s14 + $0x50] sm:$0xff] }
  0x12   : > { %284 = vst [vmem:[%s234_s15 + $0x10] sm:$0xff] %v283_v2  ;;  %v291_v6 = vld [vmem:[%s236_s14 + $0x60] sm:$0xff]  ;;  %v293_v7 = vld [vmem:[%s236_s14 + $0x70] sm:$0xff] }
  0x13   : > { %286 = vst [vmem:[%s234_s15 + $0x18] sm:$0xff] %v285_v3 }
  0x14   : > { %288 = vst [vmem:[%s234_s15 + $0x20] sm:$0xff] %v287_v4 }
  0x15   : > { %290 = vst [vmem:[%s234_s15 + $0x28] sm:$0xff] %v289_v5 }
  0x16   : > { %292 = vst [vmem:[%s234_s15 + $0x30] sm:$0xff] %v291_v6 }
  0x17   : > { %294 = vst [vmem:[%s234_s15 + $0x38] sm:$0xff] %v293_v7 }
  0x18 PF: > { %p1804_p5 = scmp.ge.s32.totalorder %s2122_s26, 1  ;;  %p299_p6 = scmp.lt.s32.totalorder %s2122_s26, 3 }
  0x1a   : > { %p300_p7 = pnand %p1804_p5, %p299_p6 }
  0x1b   : > { %s306_s14 = sand.u32 (!%p300_p7), 1, %s2114_s24   ;;  %s2125_s19 = smov (!%p300_p7), 64  }
  0x1c   : > { %303 = sbr.rel (%p300_p7) target bundleno = 4953 (0x1359), region = 82  ;;  %s1805_s17 = sshll.u32 (!%p300_p7), %s306_s14, 6 }
  0x1d   : > { %s2276_s24 = scalar_lea.vmem (!%p300_p7), [#allocation3], %s1805_s17  ;;  %s2126_s20 = smov (!%p300_p7), 96  }
  0x1e   : > { %s2127_s21 = smov (!%p300_p7), 32   ;;  %p336_p8 = scmp.lt.s32.totalorder (!%p300_p7), %s1798_s27, 1 }
  0x21   : > { %v1817_v8 = vld [vmem:[%s2650_s1 + $0x10] sm:$0xf]  ;;  %v1923_v9 = vld [vmem:[%s2650_s1 + $0x14] sm:$0xf0]  ;;  %v1922_v10 = vld [vmem:[%s2650_s1 + $0x14] sm:$0xf] }
  0x22   : > { %v1818_v11 = vor.u32 %v1923_v9, %v1817_v8  ;;  %v1819_v12 = vld [vmem:[%s2650_s1 + $0x18] sm:$0xf0]  ;;  %v1857_v13 = vld [vmem:[%s2652_s3 + $0x30] sm:$0xf]  ;;  %v1931_v14 = vld [vmem:[%s2652_s3 + $0x34] sm:$0xf0] }
  0x23   : > { %v1822_v15 = vor.u32 %v1922_v10, %v1819_v12  ;;  %v2222_v16 = vor.u32 %v1931_v14, %v1857_v13  ;;  %v1930_v17 = vld [vmem:[%s2652_s3 + $0x34] sm:$0xf]  ;;  %v1859_v18 = vld [vmem:[%s2652_s3 + $0x38] sm:$0xf0]  ;;  %v1809_v19 = vld [vmem:[%s2650_s1] sm:$0xf] }
  0x24   : > { %402 = vmatpush.bf16.msra.mxu0 %v1818_v11  ;;  %v2233_v20 = vor.u32 %v1930_v17, %v1859_v18  ;;  %v1921_v21 = vld [vmem:[%s2650_s1 + $0x4] sm:$0xf0]  ;;  %v1920_v22 = vld [vmem:[%s2650_s1 + $0x4] sm:$0xf]  ;;  %v1811_v23 = vld [vmem:[%s2650_s1 + $0x8] sm:$0xf0] }
  0x25   : > { %431 = vmatpush.bf16.msra.mxu1 %v1822_v15  ;;  %532 = vmatpush.bf16.msra.mxu2 %v2222_v16  ;;  %v1810_v24 = vor.u32 %v1921_v21, %v1809_v19  ;;  %v1814_v25 = vor.u32 %v1920_v22, %v1811_v23  ;;  %v1849_v26 = vld [vmem:[%s2652_s3 + $0x20] sm:$0xf]  ;;  %v1929_v27 = vld [vmem:[%s2652_s3 + $0x24] sm:$0xf0]  ;;  %v1928_v28 = vld [vmem:[%s2652_s3 + $0x24] sm:$0xf] }
  0x26   : > { %545 = vmatpush.bf16.msra.mxu3 %v2233_v20  ;;  %v2255_v29 = vor.u32 %v1929_v27, %v1849_v26  ;;  %v1851_v30 = vld [vmem:[%s2652_s3 + $0x28] sm:$0xf0]  ;;  %v1841_v31 = vld [vmem:[%s2652_s3 + $0x10] sm:$0xf]  ;;  %v1927_v33 = vld [vmem:[%s2652_s3 + $0x14] sm:$0xf0] }
  0x27   : > { %v2264_v32 = vor.u32 %v1928_v28, %v1851_v30  ;;  %v1926_v34 = vld [vmem:[%s2652_s3 + $0x14] sm:$0xf]  ;;  %v1843_v35 = vld [vmem:[%s2652_s3 + $0x18] sm:$0xf0]  ;;  %v341_v36 = vld [vmem:[%s2276_s24] sm:$0xff]  ;;  %vm383_vm0 = vcmask 261120   ;;  %v2280_v38 = vor.u32 %v1927_v33, %v1841_v31 }
  0x28   : > { %403 = vmatpush.bf16.msra.mxu0 %v1810_v24  ;;  %v342_v37 = vld [vmem:[%s2276_s24 + $0x8] sm:$0xff]  ;;  %v2283_v40 = vor.u32 %v1926_v34, %v1843_v35  ;;  %v1833_v41 = vld [vmem:[%s2652_s3] sm:$0xf]  ;;  %v1924_v43 = vld [vmem:[%s2652_s3 + $0x4] sm:$0xf]  ;;  %v2124_v47 = vmov 0  }
  0x29   : > { %432 = vmatpush.bf16.msra.mxu1 %v1814_v25  ;;  %533 = vmatpush.bf16.msra.mxu2 %v2255_v29  ;;  %v349_v39 = vpack.c.bf16 %v342_v37, %v341_v36  ;;  %v1925_v42 = vld [vmem:[%s2652_s3 + $0x4] sm:$0xf0]  ;;  %v1835_v44 = vld [vmem:[%s2652_s3 + $0x8] sm:$0xf0]  ;;  %v343_v48 = vld [vmem:[%s2276_s24 + $0x10] sm:$0xff]  ;;  %vm455_vm1 = vcmask 523264  }
  0x2a   : > { %546 = vmatpush.bf16.msra.mxu3 %v2264_v32  ;;  %v2302_v45 = vor.u32 %v1925_v42, %v1833_v41  ;;  %v2305_v46 = vor.u32 %v1924_v43, %v1835_v44  ;;  %v344_v49 = vld [vmem:[%s2276_s24 + $0x18] sm:$0xff]  ;;  %v345_v51 = vld [vmem:[%s2276_s24 + $0x20] sm:$0xff]  ;;  %v346_v52 = vld [vmem:[%s2276_s24 + $0x28] sm:$0xff]  ;;  %s2661_s27 = smov (!%p336_p8, %s1798_s27), 1 }
  0x2b   : > { %1823 = vmatmul.msk.bf16.vlgmr.msra.gmra.mxu0 %vm383_vm0, %v349_v39  ;;  %v350_v50 = vpack.c.bf16 %v344_v49, %v343_v48  ;;  %v351_v53 = vpack.c.bf16 %v346_v52, %v345_v51  ;;  %v347_v54 = vld [vmem:[%s2276_s24 + $0x30] sm:$0xff]  ;;  %v348_v55 = vld [vmem:[%s2276_s24 + $0x38] sm:$0xff]  ;;  %v357_v57 = vld [vmem:[%s2651_s2] sm:$0x3]  ;;  %s1806_s12 = sshll.u32 %s2661_s27, 3 }
  0x2c   : > { %1117 = vmatpush.bf16.msrb.mxu0 %v2222_v16  ;;  %1827 = vmatmul.msk.bf16.vlgmr.msra.gmra.mxu1 %vm383_vm0, %v349_v39  ;;  %v352_v56 = vpack.c.bf16 %v348_v55, %v347_v54  ;;  %v359_v58 = vperm.slane %v357_v57, 0  ;;  %v360_v59 = vperm.slane %v357_v57, 1  ;;  %v479_v2 = vld [vmem:[%s2653_s4] sm:$0x3]  ;;  %s339_s17 = scalar_lea.vmem %s2656_s7, %s1806_s12 }
  0x2d   : > { %1130 = vmatpush.bf16.msrb.mxu1 %v2233_v20  ;;  %534 = vmatpush.bf16.msra.mxu2 %v2280_v38  ;;  %v2364_v5 = vperm.slane %v479_v2, 0  ;;  %v2368_v11 = vperm.slane %v479_v2, 1 }
  0x2e   : > { %547 = vmatpush.bf16.msra.mxu3 %v2283_v40 }
  0x30   : > { %1118 = vmatpush.bf16.msrb.mxu0 %v2255_v29 }
  0x31   : > { %1131 = vmatpush.bf16.msrb.mxu1 %v2264_v32  ;;  %535 = vmatpush.bf16.msra.mxu2 %v2302_v45 }
  0x32   : > { %548 = vmatpush.bf16.msra.mxu3 %v2305_v46 }
  0x34   : > { %1119 = vmatpush.bf16.msrb.mxu0 %v2280_v38  ;;  %536 = vmatmul.bf16.vlgmr.msra.gmra.mxu2 %v2124_v47 }
  0x35   : > { %673 = vmatpush.bf16.msrb.mxu2 %v2222_v16  ;;  %1132 = vmatpush.bf16.msrb.mxu1 %v2283_v40 }
  0x36   : > { %686 = vmatpush.bf16.msrb.mxu3 %v2233_v20 }
  0x37   : > { %549 = vmatmul.bf16.vlgmr.msra.gmra.mxu3 %v2124_v47 }
  0x38   : > { %1120 = vmatpush.bf16.msrb.mxu0 %v2302_v45 }
  0x39   : > { %674 = vmatpush.bf16.msrb.mxu2 %v2255_v29  ;;  %1133 = vmatpush.bf16.msrb.mxu1 %v2305_v46 }
  0x3a   : > { %687 = vmatpush.bf16.msrb.mxu3 %v2264_v32 }
  0x3b   : > { %1824 = vmatmul.msk.bf16.gmra.mxu0 %vm383_vm0, %v350_v50 }
  0x3c   : > { %1405 = vmatpush.bf16.msra.mxu0 %v2222_v16  ;;  %1828 = vmatmul.msk.bf16.gmra.mxu1 %vm383_vm0, %v350_v50 }
  0x3d   : > { %1418 = vmatpush.bf16.msra.mxu1 %v2233_v20  ;;  %675 = vmatpush.bf16.msrb.mxu2 %v2280_v38 }
  0x3e   : > { %688 = vmatpush.bf16.msrb.mxu3 %v2283_v40 }
  0x40   : > { %1406 = vmatpush.bf16.msra.mxu0 %v2255_v29 }
  0x41   : > { %1419 = vmatpush.bf16.msra.mxu1 %v2264_v32  ;;  %676 = vmatpush.bf16.msrb.mxu2 %v2302_v45 }
  0x42   : > { %689 = vmatpush.bf16.msrb.mxu3 %v2305_v46 }
  0x44   : > { %1407 = vmatpush.bf16.msra.mxu0 %v2280_v38 }
  0x45   : > { %821 = vmatpush.bf16.msra.mxu2 %v2222_v16  ;;  %1420 = vmatpush.bf16.msra.mxu1 %v2283_v40 }
  0x46   : > { %834 = vmatpush.bf16.msra.mxu3 %v2233_v20 }
  0x48   : > { %1408 = vmatpush.bf16.msra.mxu0 %v2302_v45 }
  0x49   : > { %822 = vmatpush.bf16.msra.mxu2 %v2255_v29  ;;  %1421 = vmatpush.bf16.msra.mxu1 %v2305_v46 }
  0x4a   : > { %835 = vmatpush.bf16.msra.mxu3 %v2264_v32 }
  0x4b   : > { %1825 = vmatmul.msk.bf16.gmra.mxu0 %vm383_vm0, %v351_v53 }
  0x4c   : > { %1829 = vmatmul.msk.bf16.gmra.mxu1 %vm383_vm0, %v351_v53 }
  0x4d   : > { %823 = vmatpush.bf16.msra.mxu2 %v2280_v38 }
  0x4e   : > { %836 = vmatpush.bf16.msra.mxu3 %v2283_v40 }
  0x51   : > { %824 = vmatpush.bf16.msra.mxu2 %v2302_v45 }
  0x52   : > { %837 = vmatpush.bf16.msra.mxu3 %v2305_v46 }
  0x5b   : > { %1826 = vmatmul.msk.bf16.gmra.mxu0 %vm383_vm0, %v352_v56 }
  0x5c   : > { %1830 = vmatmul.msk.bf16.gmra.mxu1 %vm383_vm0, %v352_v56 }
  0xa8   : > { %v405_v60 = vpop.f32.mrf.mxu0 }
  0xa9   : > { %v434_v61 = vpop.f32.mrf.mxu1  ;;  %v2354_v62 = vadd.f32 %v405_v60, %v359_v58 }
  0xaa   : > { %v435_v63 = vadd.f32 %v434_v61, %v360_v59 }
  0xab   : > { %454 = vst [vmem:[#allocation2] sm:$0xff] %v2354_v62 }
  0xac   : > { %456 = vst.msk [vmem:[#allocation2 + $0x8] sm:$0xff] %vm455_vm1, %v435_v63 }
  0xb0   : > { %v407_v0 = vpop.f32.mrf.mxu0 }
  0xb1   : > { %v436_v1 = vpop.f32.mrf.mxu1  ;;  %v2361_v3 = vadd.f32 %v407_v0, %v359_v58 }
  0xb2   : > { %v437_v4 = vadd.f32 %v436_v1, %v360_v59 }
  0xb3   : > { %457 = vst [vmem:[#allocation2 + $0x10] sm:$0xff] %v2361_v3 }
  0xb4   : > { %458 = vst.msk [vmem:[#allocation2 + $0x18] sm:$0xff] %vm455_vm1, %v437_v4 }
  0xb7   : > { %v537_v6 = vpop.f32.mrf.mxu2 }
  0xb8   : > { %v538_v7 = vadd.f32 %v537_v6, %v2364_v5  ;;  %v410_v9 = vpop.f32.mrf.mxu0 }
  0xb9   : > { %v439_v10 = vpop.f32.mrf.mxu1  ;;  %v2370_v12 = vadd.f32 %v410_v9, %v359_v58 }
  0xba   : > { %v550_v8 = vpop.f32.mrf.mxu3  ;;  %v440_v13 = vadd.f32 %v439_v10, %v360_v59  ;;  %579 = vrot.lane.b32.xlu0 %v538_v7, %s2125_s19  ;;  %v558_v43 = vadd.f32 %v538_v7, %v2354_v62 }
  0xbb   : > { %459 = vst [vmem:[#allocation2 + $0x20] sm:$0xff] %v2370_v12  ;;  %v2376_v14 = vadd.f32 %v550_v8, %v2368_v11 }
  0xbc   : > { %460 = vst.msk [vmem:[#allocation2 + $0x28] sm:$0xff] %vm455_vm1, %v440_v13  ;;  %v1863_v44 = vmul.f32 -1.442695, %v558_v43 }
  0xbe   : > { %1965 = vpow2.f32 %v1863_v44 }
  0xbf   : > { %v539_v15 = vpop.f32.mrf.mxu2 }
  0xc0   : > { %v412_v18 = vpop.f32.mrf.mxu0 }
  0xc1   : > { %v441_v19 = vpop.f32.mrf.mxu1  ;;  %v2378_v21 = vadd.f32 %v412_v18, %v359_v58 }
  0xc2   : > { %v552_v17 = vpop.f32.mrf.mxu3  ;;  %v442_v22 = vadd.f32 %v441_v19, %v360_v59  ;;  %638 = vrot.lane.b32.xlu0 %v2376_v14, %s2125_s19 }
  0xc4   : > { %462 = vst.msk [vmem:[#allocation2 + $0x38] sm:$0xff] %vm455_vm1, %v442_v22  ;;  %v1966_v49 = vpop.eup %1965 }
  0xc5   : > { %v562_v50 = vadd.f32 1.0, %v1966_v49 }
  0xc7   : > { %v574_v61 = vand.u32 2147483648, %v562_v50  ;;  %vm568_vm3 = vweird.f32 %v562_v50  ;;  %v572_v63 = vand.u32 2147483647, %v562_v50 }
  0xc8   : > { %v415_v23 = vpop.f32.mrf.mxu0 }
  0xc9   : > { %v444_v24 = vpop.f32.mrf.mxu1  ;;  %v2383_v25 = vadd.f32 %v415_v23, %v359_v58  ;;  %v575_v2 = vor.u32 1.1754944e-38, %v574_v61  ;;  %vm573_vm5 = vcmp.eq.f32.partialorder %v572_v63, 8.507059e+37 }
  0xca   : > { %v445_v26 = vadd.f32 %v444_v24, %v360_v59 }
  0xcb   : > { %463 = vst [vmem:[#allocation2 + $0x40] sm:$0xff] %v2383_v25 }
  0xcc   : > { %464 = vst.msk [vmem:[#allocation2 + $0x48] sm:$0xff] %vm455_vm1, %v445_v26 }
  0xd0   : > { %v417_v27 = vpop.f32.mrf.mxu0 }
  0xd1   : > { %v446_v28 = vpop.f32.mrf.mxu1  ;;  %v2387_v30 = vadd.f32 %v417_v27, %v359_v58 }
  0xd2   : > { %v447_v31 = vadd.f32 %v446_v28, %v360_v59 }
  0xd3   : > { %465 = vst [vmem:[#allocation2 + $0x50] sm:$0xff] %v2387_v30 }
  0xd4   : > { %466 = vst.msk [vmem:[#allocation2 + $0x58] sm:$0xff] %vm455_vm1, %v447_v31 }
  0xd8   : > { %v420_v33 = vpop.f32.mrf.mxu0 }
  0xd9   : > { %v449_v34 = vpop.f32.mrf.mxu1  ;;  %v2391_v35 = vadd.f32 %v420_v33, %v359_v58 }
  0xda   : > { %v450_v36 = vadd.f32 %v449_v34, %v360_v59 }
  0xdb   : > { %467 = vst [vmem:[#allocation2 + $0x60] sm:$0xff] %v2391_v35 }
  0xdc   : > { %468 = vst.msk [vmem:[#allocation2 + $0x68] sm:$0xff] %vm455_vm1, %v450_v36 }
  0xe0   : > { %v422_v37 = vpop.f32.mrf.mxu0 }
  0xe1   : > { %v451_v39 = vpop.f32.mrf.mxu1  ;;  %v423_v41 = vadd.f32 %v422_v37, %v359_v58 }
  0xe2   : > { %v452_v42 = vadd.f32 %v451_v39, %v360_v59 }
  0xe3   : > { %469 = vst [vmem:[#allocation2 + $0x70] sm:$0xff] %v423_v41  ;;  %v597_v47 = vadd.f32 %v538_v7, %v423_v41 }
  0xe4   : > { %470 = vst.msk [vmem:[#allocation2 + $0x78] sm:$0xff] %vm455_vm1, %v452_v42 }
  0xe5   : > { %v1864_v48 = vmul.f32 -1.442695, %v597_v47 }
  0xe7   : > { %1967 = vpow2.f32 %v1864_v48 }
  0xe8   : > { %1969 = vrcp.f32 %v562_v50 }
  0xeb   : > { %v557_v24 = vld [vmem:[#allocation2 + $0x78] sm:$0xff] }
  0xec   : > { %v617_v33 = vadd.f32 %v557_v24, %v2376_v14 }
  0xed   : > { %v1968_v51 = vpop.eup %1967 }
  0xee   : > { %v601_v52 = vadd.f32 1.0, %v1968_v51  ;;  %v1970_v53 = vpop.eup %1969  ;;  %v1865_v34 = vmul.f32 -1.442695, %v617_v33 }
  0xef   : > { %v564_v54 = vmul.f32 %v1970_v53, %v562_v50  ;;  %vm569_vm2 = vweird.f32 %v1970_v53 }
  0xf0   : > { %1971 = vrcp.f32 %v601_v52  ;;  %vm570_vm4 = vmor %vm568_vm3, %vm569_vm2  ;;  %v613_v9 = vand.u32 2147483648, %v601_v52  ;;  %vm607_vm7 = vweird.f32 %v601_v52  ;;  %v611_v10 = vand.u32 2147483647, %v601_v52 }
  0xf1   : > { %v565_v55 = vsub.f32 1.0, %v564_v54 }
  0xf2   : > { %v614_v15 = vor.u32 1.1754944e-38, %v613_v9  ;;  %vm612_vm9 = vcmp.eq.f32.partialorder %v611_v10, 8.507059e+37 }
  0xf3   : > { %v566_v57 = vmul.f32 %v1970_v53, %v565_v55 }
  0xf5   : > { %v567_v59 = vadd.f32 %v1970_v53, %v566_v57 }
  0xf6   : > { %v1972_v56 = vpop.eup %1971 }
  0xf7   : > { %v603_v58 = vmul.f32 %v1972_v56, %v601_v52  ;;  %v571_v0 = vsel %vm570_vm4, %v1970_v53, %v567_v59  ;;  %vm608_vm6 = vweird.f32 %v1972_v56 }
  0xf8   : > { %v576_v6 = vsel %vm573_vm5, %v575_v2, %v571_v0  ;;  %vm609_vm8 = vmor %vm607_vm7, %vm608_vm6 }
  0xf9   : > { %v604_v60 = vsub.f32 1.0, %v603_v58  ;;  %v589_v47 = vsub.f32 1.0, %v576_v6  ;;  %v595_v50 = vmul.f32 0.0, %v576_v6 }
  0xfb   : > { %v605_v1 = vmul.f32 %v1972_v56, %v604_v60 }
  0xfd   : > { %v606_v8 = vadd.f32 %v1972_v56, %v605_v1 }
  0xff   : > { %v610_v13 = vsel %vm609_vm8, %v1972_v56, %v606_v8 }
 0x100   : > { %v615_v18 = vsel %vm612_vm9, %v614_v15, %v610_v13 }
 0x12c   : > { %v580_v4 = vpop.permute.xlu0 %579 }
 0x12d   : > { %v582_v7 = vmul.f32 %v580_v4, %v576_v6 }
 0x12f   : > { %584 = vrot.lane.b32.xlu1 %v582_v7, %s2125_s19 }
 0x134   : > { %v639_v17 = vpop.permute.xlu0 %638 }
 0x135   : > { %v641_v19 = vmul.f32 %v639_v17, %v615_v18 }
 0x137   : > { %643 = vrot.lane.b32.xlu1 %v641_v19, %s2125_s19 }
 0x1a1   : > { %v585_v22 = vpop.permute.xlu1 %584 }
 0x1a2   : > { %v587_v23 = vadd.f32 %v585_v22, %v2354_v62 }
 0x1a4   : > { %1973 = vtanh.f32 %v587_v23 }
 0x1a9   : > { %v644_v26 = vpop.permute.xlu1 %643 }
 0x1aa   : > { %v1974_v27 = vpop.eup %1973  ;;  %v646_v28 = vadd.f32 %v644_v26, %v557_v24 }
 0x1ab   : > { %591 = vrot.lane.b32.xlu2 %v1974_v27, %s2126_s20 }
 0x1ac   : > { %1975 = vtanh.f32 %v646_v28 }
 0x1ad   : > { %1977 = vpow2.f32 %v1865_v34 }
 0x1b2   : > { %v1976_v31 = vpop.eup %1975 }
 0x1b3   : > { %650 = vrot.lane.b32.xlu2 %v1976_v31, %s2126_s20  ;;  %v1978_v36 = vpop.eup %1977 }
 0x1b4   : > { %v621_v37 = vadd.f32 1.0, %v1978_v36 }
 0x1b6   : > { %1979 = vrcp.f32 %v621_v37  ;;  %v633_v44 = vand.u32 2147483648, %v621_v37  ;;  %vm627_vm11 = vweird.f32 %v621_v37  ;;  %v631_v48 = vand.u32 2147483647, %v621_v37 }
 0x1b8   : > { %v634_v52 = vor.u32 1.1754944e-38, %v633_v44  ;;  %vm632_vm13 = vcmp.eq.f32.partialorder %v631_v48, 8.507059e+37 }
 0x1bc   : > { %v1980_v62 = vpop.eup %1979 }
 0x1bd   : > { %v623_v39 = vmul.f32 %v1980_v62, %v621_v37  ;;  %vm628_vm10 = vweird.f32 %v1980_v62 }
 0x1be   : > { %vm629_vm12 = vmor %vm627_vm11, %vm628_vm10 }
 0x1bf   : > { %v624_v41 = vsub.f32 1.0, %v623_v39 }
 0x1c1   : > { %v625_v42 = vmul.f32 %v1980_v62, %v624_v41 }
 0x1c3   : > { %v626_v43 = vadd.f32 %v1980_v62, %v625_v42 }
 0x1c5   : > { %v630_v14 = vsel %vm629_vm12, %v1980_v62, %v626_v43 }
 0x1c6   : > { %v635_v54 = vsel %vm632_vm13, %v634_v52, %v630_v14 }
 0x1c7   : > { %v648_v55 = vsub.f32 1.0, %v635_v54  ;;  %v654_v57 = vmul.f32 0.0, %v635_v54 }
 0x205   : > { %v592_v49 = vpop.permute.xlu2 %591 }
 0x206   : > { %v594_v51 = vmul.f32 %v592_v49, %v589_v47 }
 0x208   : > { %v596_v53 = vadd.f32 %v595_v50, %v594_v51 }
 0x20a   : > { %657 = vrot.lane.b32.xlu0 %v596_v53, %s2126_s20  ;;  %v698_v53 = vld [vmem:[#allocation2 + $0x68] sm:$0xff] }
 0x20d   : > { %v651_v56 = vpop.permute.xlu2 %650 }
 0x20e   : > { %v653_v58 = vmul.f32 %v651_v56, %v648_v55 }
 0x210   : > { %v655_v59 = vadd.f32 %v654_v57, %v653_v58 }
 0x212   : > { %661 = vrot.lane.b32.xlu1 %v655_v59, %s2127_s21 }
 0x27c   : > { %v658_v60 = vpop.permute.xlu0 %657 }
 0x284   : > { %v662_v61 = vpop.permute.xlu1 %661 }
 0x285   : > { %v2406_v63 = vsel %vm383_vm0, %v658_v60, %v662_v61 }
 0x286   : > { %v665_v0 = vpack.c.bf16 %v2406_v63, %v2406_v63 }
 0x288   : > { %1866 = vmatmul.msk.bf16.vlgmr.msrb.gmra.mxu2 %vm455_vm1, %v665_v0  ;;  %1867 = vmatmul.msk.bf16.vlgmr.msrb.gmra.mxu3 %vm455_vm1, %v665_v0 }
 0x289   : > { %969 = vmatpush.bf16.msrb.mxu2 %v2222_v16  ;;  %982 = vmatpush.bf16.msrb.mxu3 %v2233_v20 }
 0x28d   : > { %970 = vmatpush.bf16.msrb.mxu2 %v2255_v29  ;;  %983 = vmatpush.bf16.msrb.mxu3 %v2264_v32 }
 0x291   : > { %971 = vmatpush.bf16.msrb.mxu2 %v2280_v38  ;;  %984 = vmatpush.bf16.msrb.mxu3 %v2283_v40 }
 0x295   : > { %972 = vmatpush.bf16.msrb.mxu2 %v2302_v45  ;;  %985 = vmatpush.bf16.msrb.mxu3 %v2305_v46 }
 0x30b   : > { %v678_v1 = vpop.f32.mrf.mxu2  ;;  %v691_v2 = vpop.f32.mrf.mxu3 }
 0x30c   : > { %v679_v4 = vadd.f32 %v678_v1, %v2364_v5  ;;  %v2422_v6 = vadd.f32 %v691_v2, %v2368_v11 }
 0x30e   : > { %783 = vrot.lane.b32.xlu0 %v2422_v6, %s2125_s19  ;;  %720 = vrot.lane.b32.xlu2 %v679_v4, %s2125_s19  ;;  %v699_v9 = vadd.f32 %v679_v4, %v2361_v3  ;;  %v742_v17 = vadd.f32 %v679_v4, %v2391_v35  ;;  %v762_v60 = vadd.f32 %v698_v53, %v2422_v6 }
 0x310   : > { %v1868_v10 = vmul.f32 -1.442695, %v699_v9  ;;  %v1869_v19 = vmul.f32 -1.442695, %v742_v17  ;;  %v1870_v61 = vmul.f32 -1.442695, %v762_v60 }
 0x312   : > { %1981 = vpow2.f32 %v1868_v10 }
 0x313   : > { %v680_v7 = vpop.f32.mrf.mxu2  ;;  %v693_v8 = vpop.f32.mrf.mxu3 }
 0x318   : > { %v1982_v13 = vpop.eup %1981 }
 0x319   : > { %v703_v15 = vadd.f32 1.0, %v1982_v13 }
 0x31b   : > { %1983 = vrcp.f32 %v703_v15  ;;  %v715_v31 = vand.u32 2147483648, %v703_v15  ;;  %vm709_vm15 = vweird.f32 %v703_v15  ;;  %v713_v33 = vand.u32 2147483647, %v703_v15 }
 0x31c   : > { %1985 = vpow2.f32 %v1869_v19 }
 0x31d   : > { %v716_v36 = vor.u32 1.1754944e-38, %v715_v31  ;;  %vm714_vm3 = vcmp.eq.f32.partialorder %v713_v33, 8.507059e+37 }
 0x321   : > { %v1984_v18 = vpop.eup %1983 }
 0x322   : > { %v705_v22 = vmul.f32 %v1984_v18, %v703_v15  ;;  %v1986_v24 = vpop.eup %1985  ;;  %vm710_vm14 = vweird.f32 %v1984_v18 }
 0x323   : > { %v746_v27 = vadd.f32 1.0, %v1986_v24  ;;  %vm711_vm2 = vmor %vm709_vm15, %vm710_vm14 }
 0x324   : > { %v706_v23 = vsub.f32 1.0, %v705_v22 }
 0x325   : > { %1987 = vrcp.f32 %v746_v27  ;;  %v758_v47 = vand.u32 2147483648, %v746_v27  ;;  %vm752_vm5 = vweird.f32 %v746_v27  ;;  %v756_v48 = vand.u32 2147483647, %v746_v27 }
 0x326   : > { %v707_v26 = vmul.f32 %v1984_v18, %v706_v23 }
 0x327   : > { %v759_v50 = vor.u32 1.1754944e-38, %v758_v47  ;;  %vm757_vm7 = vcmp.eq.f32.partialorder %v756_v48, 8.507059e+37 }
 0x328   : > { %v708_v28 = vadd.f32 %v1984_v18, %v707_v26 }
 0x32a   : > { %v712_v34 = vsel %vm711_vm2, %v1984_v18, %v708_v28 }
 0x32b   : > { %v717_v35 = vsel %vm714_vm3, %v716_v36, %v712_v34  ;;  %v1988_v39 = vpop.eup %1987 }
 0x32c   : > { %v748_v41 = vmul.f32 %v1988_v39, %v746_v27  ;;  %vm753_vm4 = vweird.f32 %v1988_v39  ;;  %v730_v15 = vsub.f32 1.0, %v717_v35 }
 0x32d   : > { %vm754_vm6 = vmor %vm752_vm5, %vm753_vm4 }
 0x32e   : > { %v749_v42 = vsub.f32 1.0, %v748_v41 }
 0x330   : > { %v750_v43 = vmul.f32 %v1988_v39, %v749_v42 }
 0x332   : > { %v751_v44 = vadd.f32 %v1988_v39, %v750_v43 }
 0x334   : > { %v755_v49 = vsel %vm754_vm6, %v1988_v39, %v751_v44 }
 0x335   : > { %v760_v14 = vsel %vm757_vm7, %v759_v50, %v755_v49 }
 0x368   : > { %v721_v37 = vpop.permute.xlu2 %720 }
 0x369   : > { %v723_v62 = vmul.f32 %v721_v37, %v717_v35 }
 0x36b   : > { %725 = vrot.lane.b32.xlu1 %v723_v62, %s2125_s19 }
 0x373   : > { %737 = vrot.lane.b32.xlu1 %v2406_v63, %s2127_s21 }
 0x380   : > { %v784_v51 = vpop.permute.xlu0 %783 }
 0x381   : > { %v786_v52 = vmul.f32 %v784_v51, %v760_v14 }
 0x383   : > { %788 = vrot.lane.b32.xlu2 %v786_v52, %s2125_s19 }
 0x3dd   : > { %v789_v54 = vpop.permute.xlu2 %788  ;;  %v726_v55 = vpop.permute.xlu1 %725 }
 0x3de   : > { %v791_v56 = vadd.f32 %v789_v54, %v698_v53  ;;  %v728_v57 = vadd.f32 %v726_v55, %v2361_v3 }
 0x3e0   : > { %1989 = vtanh.f32 %v791_v56 }
 0x3e1   : > { %1991 = vtanh.f32 %v728_v57 }
 0x3e2   : > { %1993 = vpow2.f32 %v1870_v61 }
 0x3e5   : > { %v738_v9 = vpop.permute.xlu1 %737 }
 0x3e6   : > { %v1990_v58 = vpop.eup %1989  ;;  %v740_v17 = vmul.f32 %v738_v9, %v717_v35 }
 0x3e7   : > { %v1992_v59 = vpop.eup %1991  ;;  %795 = vrot.lane.b32.xlu2 %v1990_v58, %s2126_s20 }
 0x3e8   : > { %732 = vrot.lane.b32.xlu0 %v1992_v59, %s2126_s20  ;;  %v1994_v0 = vpop.eup %1993 }
 0x3e9   : > { %v766_v1 = vadd.f32 1.0, %v1994_v0 }
 0x3eb   : > { %1995 = vrcp.f32 %v766_v1  ;;  %v778_v10 = vand.u32 2147483648, %v766_v1  ;;  %vm772_vm9 = vweird.f32 %v766_v1  ;;  %v776_v13 = vand.u32 2147483647, %v766_v1 }
 0x3ed   : > { %v779_v19 = vor.u32 1.1754944e-38, %v778_v10  ;;  %vm777_vm11 = vcmp.eq.f32.partialorder %v776_v13, 8.507059e+37 }
 0x3f0   : > { %799 = vrot.lane.b32.xlu0 %v2406_v63, %s2126_s20 }
 0x3f1   : > { %v1996_v2 = vpop.eup %1995 }
 0x3f2   : > { %v768_v3 = vmul.f32 %v1996_v2, %v766_v1  ;;  %vm773_vm8 = vweird.f32 %v1996_v2 }
 0x3f3   : > { %vm774_vm10 = vmor %vm772_vm9, %vm773_vm8 }
 0x3f4   : > { %v769_v4 = vsub.f32 1.0, %v768_v3 }
 0x3f6   : > { %v770_v7 = vmul.f32 %v1996_v2, %v769_v4 }
 0x3f8   : > { %v771_v8 = vadd.f32 %v1996_v2, %v770_v7 }
 0x3fa   : > { %v775_v6 = vsel %vm774_vm10, %v1996_v2, %v771_v8 }
 0x3fb   : > { %v780_v23 = vsel %vm777_vm11, %v779_v19, %v775_v6 }
 0x3fc   : > { %v793_v26 = vsub.f32 1.0, %v780_v23 }
 0x441   : > { %v796_v24 = vpop.permute.xlu2 %795 }
 0x442   : > { %v798_v28 = vmul.f32 %v796_v24, %v793_v26  ;;  %v846_v24 = vld [vmem:[#allocation2 + $0x58] sm:$0xff] }
 0x45a   : > { %v733_v63 = vpop.permute.xlu0 %732 }
 0x45b   : > { %v735_v18 = vmul.f32 %v733_v63, %v730_v15 }
 0x45d   : > { %v741_v22 = vadd.f32 %v740_v17, %v735_v18 }
 0x45f   : > { %805 = vrot.lane.b32.xlu1 %v741_v22, %s2126_s20 }
 0x462   : > { %v800_v27 = vpop.permute.xlu0 %799 }
 0x463   : > { %v802_v31 = vmul.f32 %v800_v27, %v780_v23 }
 0x465   : > { %v803_v33 = vadd.f32 %v802_v31, %v798_v28 }
 0x467   : > { %809 = vrot.lane.b32.xlu2 %v803_v33, %s2127_s21 }
 0x4c1   : > { %v810_v34 = vpop.permute.xlu2 %809 }
 0x4d1   : > { %v806_v36 = vpop.permute.xlu1 %805 }
 0x4d2   : > { %v2442_v37 = vsel %vm383_vm0, %v806_v36, %v810_v34 }
 0x4d3   : > { %v813_v35 = vpack.c.bf16 %v2442_v37, %v2442_v37 }
 0x4d5   : > { %1871 = vmatmul.msk.bf16.vlgmr.msra.gmra.mxu2 %vm455_vm1, %v813_v35  ;;  %1872 = vmatmul.msk.bf16.vlgmr.msra.gmra.mxu3 %vm455_vm1, %v813_v35 }
 0x4d6   : > { %1274 = vmatpush.bf16.msra.mxu3 %v2233_v20  ;;  %1261 = vmatpush.bf16.msra.mxu2 %v2222_v16 }
 0x4da   : > { %1275 = vmatpush.bf16.msra.mxu3 %v2264_v32  ;;  %1262 = vmatpush.bf16.msra.mxu2 %v2255_v29 }
 0x4de   : > { %1276 = vmatpush.bf16.msra.mxu3 %v2283_v40  ;;  %1263 = vmatpush.bf16.msra.mxu2 %v2280_v38 }
 0x4e2   : > { %1277 = vmatpush.bf16.msra.mxu3 %v2305_v46  ;;  %1264 = vmatpush.bf16.msra.mxu2 %v2302_v45 }
 0x558   : > { %v826_v62 = vpop.f32.mrf.mxu2  ;;  %v839_v39 = vpop.f32.mrf.mxu3 }
 0x559   : > { %v827_v41 = vadd.f32 %v826_v62, %v2364_v5  ;;  %v2458_v42 = vadd.f32 %v839_v39, %v2368_v11 }
 0x55b   : > { %931 = vrot.lane.b32.xlu1 %v2458_v42, %s2125_s19  ;;  %868 = vrot.lane.b32.xlu0 %v827_v41, %s2125_s19  ;;  %v847_v47 = vadd.f32 %v827_v41, %v2370_v12  ;;  %v890_v48 = vadd.f32 %v827_v41, %v2387_v30  ;;  %v910_v31 = vadd.f32 %v846_v24, %v2458_v42 }
 0x55d   : > { %v1873_v49 = vmul.f32 -1.442695, %v847_v47  ;;  %v1874_v50 = vmul.f32 -1.442695, %v890_v48  ;;  %v1875_v33 = vmul.f32 -1.442695, %v910_v31 }
 0x55f   : > { %1997 = vpow2.f32 %v1873_v49 }
 0x560   : > { %v828_v43 = vpop.f32.mrf.mxu2  ;;  %v841_v44 = vpop.f32.mrf.mxu3  ;;  %1999 = vpow2.f32 %v1874_v50 }
 0x565   : > { %v1998_v51 = vpop.eup %1997 }
 0x566   : > { %v2000_v14 = vpop.eup %1999  ;;  %v851_v52 = vadd.f32 1.0, %v1998_v51 }
 0x567   : > { %v894_v53 = vadd.f32 1.0, %v2000_v14 }
 0x568   : > { %2001 = vrcp.f32 %v851_v52  ;;  %vm857_vm14 = vweird.f32 %v851_v52  ;;  %v863_v2 = vand.u32 2147483648, %v851_v52  ;;  %v861_v4 = vand.u32 2147483647, %v851_v52 }
 0x569   : > { %2003 = vrcp.f32 %v894_v53  ;;  %v906_v1 = vand.u32 2147483648, %v894_v53  ;;  %vm900_vm15 = vweird.f32 %v894_v53  ;;  %v904_v3 = vand.u32 2147483647, %v894_v53 }
 0x56a   : > { %v864_v10 = vor.u32 1.1754944e-38, %v863_v2  ;;  %vm862_vm5 = vcmp.eq.f32.partialorder %v861_v4, 8.507059e+37 }
 0x56b   : > { %v907_v9 = vor.u32 1.1754944e-38, %v906_v1  ;;  %vm905_vm4 = vcmp.eq.f32.partialorder %v904_v3, 8.507059e+37 }
 0x56e   : > { %v2002_v54 = vpop.eup %2001 }
 0x56f   : > { %v2004_v55 = vpop.eup %2003  ;;  %v853_v57 = vmul.f32 %v2002_v54, %v851_v52  ;;  %vm858_vm12 = vweird.f32 %v2002_v54 }
 0x570   : > { %v896_v56 = vmul.f32 %v2004_v55, %v894_v53  ;;  %vm901_vm13 = vweird.f32 %v2004_v55  ;;  %vm859_vm2 = vmor %vm857_vm14, %vm858_vm12 }
 0x571   : > { %v854_v59 = vsub.f32 1.0, %v853_v57  ;;  %vm902_vm3 = vmor %vm900_vm15, %vm901_vm13 }
 0x572   : > { %v897_v58 = vsub.f32 1.0, %v896_v56 }
 0x573   : > { %v855_v61 = vmul.f32 %v2002_v54, %v854_v59 }
 0x574   : > { %v898_v60 = vmul.f32 %v2004_v55, %v897_v58 }
 0x575   : > { %v856_v0 = vadd.f32 %v2002_v54, %v855_v61 }
 0x576   : > { %v899_v30 = vadd.f32 %v2004_v55, %v898_v60 }
 0x577   : > { %v860_v8 = vsel %vm859_vm2, %v2002_v54, %v856_v0 }
 0x578   : > { %v903_v7 = vsel %vm902_vm3, %v2004_v55, %v899_v30  ;;  %v865_v17 = vsel %vm862_vm5, %v864_v10, %v860_v8 }
 0x579   : > { %v908_v15 = vsel %vm905_vm4, %v907_v9, %v903_v7  ;;  %v878_v62 = vsub.f32 1.0, %v865_v17 }
 0x5cd   : > { %v932_v13 = vpop.permute.xlu1 %931  ;;  %v869_v63 = vpop.permute.xlu0 %868 }
 0x5ce   : > { %v934_v6 = vmul.f32 %v932_v13, %v908_v15  ;;  %v871_v18 = vmul.f32 %v869_v63, %v865_v17 }
 0x5d0   : > { %936 = vrot.lane.b32.xlu0 %v934_v6, %s2125_s19  ;;  %873 = vrot.lane.b32.xlu2 %v871_v18, %s2125_s19 }
 0x5d8   : > { %885 = vrot.lane.b32.xlu2 %v2442_v37, %s2127_s21 }
 0x62a   : > { %v874_v19 = vpop.permute.xlu2 %873 }
 0x62b   : > { %v876_v22 = vadd.f32 %v874_v19, %v2370_v12 }
 0x62d   : > { %2005 = vtanh.f32 %v876_v22 }
 0x632   : > { %v886_v35 = vpop.permute.xlu2 %885 }
 0x633   : > { %v2006_v23 = vpop.eup %2005  ;;  %v888_v41 = vmul.f32 %v886_v35, %v865_v17 }
 0x634   : > { %880 = vrot.lane.b32.xlu1 %v2006_v23, %s2126_s20 }
 0x63c   : > { %947 = vrot.lane.b32.xlu1 %v2442_v37, %s2126_s20 }
 0x642   : > { %v937_v26 = vpop.permute.xlu0 %936 }
 0x643   : > { %v939_v27 = vadd.f32 %v937_v26, %v846_v24 }
 0x645   : > { %2007 = vtanh.f32 %v939_v27 }
 0x646   : > { %2009 = vpow2.f32 %v1875_v33 }
 0x64b   : > { %v2008_v28 = vpop.eup %2007 }
 0x64c   : > { %943 = vrot.lane.b32.xlu0 %v2008_v28, %s2126_s20  ;;  %v2010_v34 = vpop.eup %2009 }
 0x64d   : > { %v914_v12 = vadd.f32 1.0, %v2010_v34 }
 0x64f   : > { %2011 = vrcp.f32 %v914_v12  ;;  %v926_v42 = vand.u32 2147483648, %v914_v12  ;;  %vm920_vm7 = vweird.f32 %v914_v12  ;;  %v924_v50 = vand.u32 2147483647, %v914_v12 }
 0x651   : > { %v927_v14 = vor.u32 1.1754944e-38, %v926_v42  ;;  %vm925_vm9 = vcmp.eq.f32.partialorder %v924_v50, 8.507059e+37 }
 0x655   : > { %v2012_v36 = vpop.eup %2011 }
 0x656   : > { %v916_v43 = vmul.f32 %v2012_v36, %v914_v12  ;;  %vm921_vm6 = vweird.f32 %v2012_v36 }
 0x657   : > { %vm922_vm8 = vmor %vm920_vm7, %vm921_vm6 }
 0x658   : > { %v917_v47 = vsub.f32 1.0, %v916_v43 }
 0x65a   : > { %v918_v48 = vmul.f32 %v2012_v36, %v917_v47 }
 0x65c   : > { %v919_v49 = vadd.f32 %v2012_v36, %v918_v48 }
 0x65e   : > { %v923_v51 = vsel %vm922_vm8, %v2012_v36, %v919_v49 }
 0x65f   : > { %v928_v52 = vsel %vm925_vm9, %v927_v14, %v923_v51 }
 0x660   : > { %v941_v54 = vsub.f32 1.0, %v928_v52 }
 0x6a6   : > { %v881_v39 = vpop.permute.xlu1 %880 }
 0x6a7   : > { %v883_v37 = vmul.f32 %v881_v39, %v878_v62 }
 0x6a9   : > { %v889_v44 = vadd.f32 %v888_v41, %v883_v37  ;;  %v994_v41 = vld [vmem:[#allocation2 + $0x48] sm:$0xff] }
 0x6ab   : > { %953 = vrot.lane.b32.xlu2 %v889_v44, %s2126_s20 }
 0x6ae   : > { %v948_v53 = vpop.permute.xlu1 %947 }
 0x6af   : > { %v950_v56 = vmul.f32 %v948_v53, %v928_v52 }
 0x6be   : > { %v944_v55 = vpop.permute.xlu0 %943 }
 0x6bf   : > { %v946_v57 = vmul.f32 %v944_v55, %v941_v54 }
 0x6c1   : > { %v951_v58 = vadd.f32 %v950_v56, %v946_v57 }
 0x6c3   : > { %957 = vrot.lane.b32.xlu0 %v951_v58, %s2127_s21 }
 0x705   : > { %v954_v59 = vpop.permute.xlu2 %953 }
 0x735   : > { %v958_v60 = vpop.permute.xlu0 %957 }
 0x736   : > { %v2478_v61 = vsel %vm383_vm0, %v954_v59, %v958_v60 }
 0x737   : > { %v961_v30 = vpack.c.bf16 %v2478_v61, %v2478_v61 }
 0x739   : > { %1876 = vmatmul.msk.bf16.vlgmr.msrb.gmra.mxu2 %vm455_vm1, %v961_v30  ;;  %1877 = vmatmul.msk.bf16.vlgmr.msrb.gmra.mxu3 %vm455_vm1, %v961_v30 }
 0x73a   : > { %1549 = vmatpush.bf16.msrb.mxu2 %v2222_v16  ;;  %1562 = vmatpush.bf16.msrb.mxu3 %v2233_v20 }
 0x73e   : > { %1550 = vmatpush.bf16.msrb.mxu2 %v2255_v29  ;;  %1563 = vmatpush.bf16.msrb.mxu3 %v2264_v32 }
 0x742   : > { %1551 = vmatpush.bf16.msrb.mxu2 %v2280_v38  ;;  %1564 = vmatpush.bf16.msrb.mxu3 %v2283_v40 }
 0x746   : > { %1552 = vmatpush.bf16.msrb.mxu2 %v2302_v45  ;;  %1565 = vmatpush.bf16.msrb.mxu3 %v2305_v46 }
 0x7bc   : > { %v974_v0 = vpop.f32.mrf.mxu2  ;;  %v987_v1 = vpop.f32.mrf.mxu3 }
 0x7bd   : > { %v975_v2 = vadd.f32 %v974_v0, %v2364_v5  ;;  %v2494_v16 = vadd.f32 %v987_v1, %v2368_v11 }
 0x7bf   : > { %1079 = vrot.lane.b32.xlu2 %v2494_v16, %s2125_s19  ;;  %1016 = vrot.lane.b32.xlu1 %v975_v2, %s2125_s19  ;;  %v1038_v32 = vadd.f32 %v975_v2, %v2383_v25  ;;  %v995_v46 = vadd.f32 %v975_v2, %v2378_v21  ;;  %v1058_v42 = vadd.f32 %v994_v41, %v2494_v16 }
 0x7c1   : > { %v1879_v38 = vmul.f32 -1.442695, %v1038_v32  ;;  %v1878_v4 = vmul.f32 -1.442695, %v995_v46  ;;  %v1880_v50 = vmul.f32 -1.442695, %v1058_v42 }
 0x7c3   : > { %2013 = vpow2.f32 %v1879_v38 }
 0x7c4   : > { %v976_v20 = vpop.f32.mrf.mxu2  ;;  %v989_v29 = vpop.f32.mrf.mxu3 }
 0x7c9   : > { %v2014_v40 = vpop.eup %2013 }
 0x7ca   : > { %v1042_v45 = vadd.f32 1.0, %v2014_v40 }
 0x7cc   : > { %2015 = vrcp.f32 %v1042_v45  ;;  %v1054_v63 = vand.u32 2147483648, %v1042_v45  ;;  %vm1048_vm11 = vweird.f32 %v1042_v45  ;;  %v1052_v17 = vand.u32 2147483647, %v1042_v45 }
 0x7cd   : > { %2017 = vpow2.f32 %v1878_v4 }
 0x7ce   : > { %v1055_v18 = vor.u32 1.1754944e-38, %v1054_v63  ;;  %vm1053_vm13 = vcmp.eq.f32.partialorder %v1052_v17, 8.507059e+37 }
 0x7d2   : > { %v2016_v3 = vpop.eup %2015 }
 0x7d3   : > { %v1044_v7 = vmul.f32 %v2016_v3, %v1042_v45  ;;  %v2018_v9 = vpop.eup %2017  ;;  %vm1049_vm10 = vweird.f32 %v2016_v3 }
 0x7d4   : > { %v999_v13 = vadd.f32 1.0, %v2018_v9  ;;  %vm1050_vm12 = vmor %vm1048_vm11, %vm1049_vm10 }
 0x7d5   : > { %v1045_v8 = vsub.f32 1.0, %v1044_v7 }
 0x7d6   : > { %2019 = vrcp.f32 %v999_v13  ;;  %v1011_v33 = vand.u32 2147483648, %v999_v13  ;;  %vm1005_vm15 = vweird.f32 %v999_v13  ;;  %v1009_v34 = vand.u32 2147483647, %v999_v13 }
 0x7d7   : > { %v1046_v10 = vmul.f32 %v2016_v3, %v1045_v8 }
 0x7d8   : > { %v1012_v36 = vor.u32 1.1754944e-38, %v1011_v33  ;;  %vm1010_vm3 = vcmp.eq.f32.partialorder %v1009_v34, 8.507059e+37 }
 0x7d9   : > { %v1047_v15 = vadd.f32 %v2016_v3, %v1046_v10 }
 0x7db   : > { %v1051_v6 = vsel %vm1050_vm12, %v2016_v3, %v1047_v15 }
 0x7dc   : > { %v1056_v22 = vsel %vm1053_vm13, %v1055_v18, %v1051_v6  ;;  %v2020_v24 = vpop.eup %2019 }
 0x7dd   : > { %v1001_v26 = vmul.f32 %v2020_v24, %v999_v13  ;;  %vm1006_vm14 = vweird.f32 %v2020_v24 }
 0x7de   : > { %vm1007_vm2 = vmor %vm1005_vm15, %vm1006_vm14 }
 0x7df   : > { %v1002_v27 = vsub.f32 1.0, %v1001_v26 }
 0x7e1   : > { %v1003_v28 = vmul.f32 %v2020_v24, %v1002_v27 }
 0x7e3   : > { %v1004_v31 = vadd.f32 %v2020_v24, %v1003_v28 }
 0x7e5   : > { %v1008_v12 = vsel %vm1007_vm2, %v2020_v24, %v1004_v31 }
 0x7e6   : > { %v1013_v62 = vsel %vm1010_vm3, %v1012_v36, %v1008_v12 }
 0x7e7   : > { %v1026_v60 = vsub.f32 1.0, %v1013_v62 }
 0x819   : > { %v1080_v19 = vpop.permute.xlu2 %1079 }
 0x81a   : > { %v1082_v23 = vmul.f32 %v1080_v19, %v1056_v22 }
 0x81c   : > { %1084 = vrot.lane.b32.xlu1 %v1082_v23, %s2125_s19 }
 0x831   : > { %v1017_v35 = vpop.permute.xlu1 %1016 }
 0x832   : > { %v1019_v39 = vmul.f32 %v1017_v35, %v1013_v62 }
 0x834   : > { %1021 = vrot.lane.b32.xlu0 %v1019_v39, %s2125_s19 }
 0x83c   : > { %1033 = vrot.lane.b32.xlu0 %v2478_v61, %s2127_s21 }
 0x88e   : > { %v1085_v37 = vpop.permute.xlu1 %1084 }
 0x88f   : > { %v1087_v43 = vadd.f32 %v1085_v37, %v994_v41 }
 0x891   : > { %2021 = vtanh.f32 %v1087_v43 }
 0x897   : > { %v2022_v44 = vpop.eup %2021 }
 0x898   : > { %1091 = vrot.lane.b32.xlu1 %v2022_v44, %s2126_s20 }
 0x8a6   : > { %v1022_v47 = vpop.permute.xlu0 %1021 }
 0x8a7   : > { %v1024_v48 = vadd.f32 %v1022_v47, %v2378_v21 }
 0x8a9   : > { %2023 = vtanh.f32 %v1024_v48 }
 0x8aa   : > { %2025 = vpow2.f32 %v1880_v50 }
 0x8ae   : > { %v1034_v57 = vpop.permute.xlu0 %1033 }
 0x8af   : > { %v2024_v49 = vpop.eup %2023  ;;  %v1036_v30 = vmul.f32 %v1034_v57, %v1013_v62 }
 0x8b0   : > { %1028 = vrot.lane.b32.xlu2 %v2024_v49, %s2126_s20  ;;  %v2026_v51 = vpop.eup %2025 }
 0x8b1   : > { %v1062_v14 = vadd.f32 1.0, %v2026_v51 }
 0x8b3   : > { %2027 = vrcp.f32 %v1062_v14  ;;  %v1074_v58 = vand.u32 2147483648, %v1062_v14  ;;  %vm1068_vm5 = vweird.f32 %v1062_v14  ;;  %v1072_v59 = vand.u32 2147483647, %v1062_v14 }
 0x8b5   : > { %v1075_v2 = vor.u32 1.1754944e-38, %v1074_v58  ;;  %vm1073_vm7 = vcmp.eq.f32.partialorder %v1072_v59, 8.507059e+37  ;;  %v2093_v58 = vld [vmem:[#allocation2 + $0x40] sm:$0xff] }
 0x8b8   : > { %1095 = vrot.lane.b32.xlu2 %v2478_v61, %s2126_s20 }
 0x8b9   : > { %v2028_v52 = vpop.eup %2027 }
 0x8ba   : > { %v1064_v53 = vmul.f32 %v2028_v52, %v1062_v14  ;;  %vm1069_vm4 = vweird.f32 %v2028_v52 }
 0x8bb   : > { %vm1070_vm6 = vmor %vm1068_vm5, %vm1069_vm4 }
 0x8bc   : > { %v1065_v54 = vsub.f32 1.0, %v1064_v53 }
 0x8be   : > { %v1066_v55 = vmul.f32 %v2028_v52, %v1065_v54  ;;  %v992_v54 = vld [vmem:[#allocation2 + $0x38] sm:$0xff] }
 0x8c0   : > { %v1067_v56 = vadd.f32 %v2028_v52, %v1066_v55 }
 0x8c2   : > { %v1071_v0 = vsel %vm1070_vm6, %v2028_v52, %v1067_v56 }
 0x8c3   : > { %v1076_v20 = vsel %vm1073_vm7, %v1075_v2, %v1071_v0 }
 0x8c4   : > { %v1089_v32 = vsub.f32 1.0, %v1076_v20 }
 0x90a   : > { %v1029_v61 = vpop.permute.xlu2 %1028  ;;  %v1092_v29 = vpop.permute.xlu1 %1091 }
 0x90b   : > { %v1031_v1 = vmul.f32 %v1029_v61, %v1026_v60  ;;  %v1094_v40 = vmul.f32 %v1092_v29, %v1089_v32 }
 0x90d   : > { %v1037_v16 = vadd.f32 %v1036_v30, %v1031_v1 }
 0x90f   : > { %1101 = vrot.lane.b32.xlu0 %v1037_v16, %s2126_s20 }
 0x912   : > { %v1096_v38 = vpop.permute.xlu2 %1095 }
 0x913   : > { %v1098_v45 = vmul.f32 %v1096_v38, %v1076_v20 }
 0x915   : > { %v1099_v46 = vadd.f32 %v1098_v45, %v1094_v40 }
 0x917   : > { %1105 = vrot.lane.b32.xlu1 %v1099_v46, %s2127_s21 }
 0x981   : > { %v1102_v3 = vpop.permute.xlu0 %1101 }
 0x989   : > { %v1106_v4 = vpop.permute.xlu1 %1105 }
 0x98a   : > { %v2514_v7 = vsel %vm383_vm0, %v1102_v3, %v1106_v4 }
 0x98b   : > { %v1109_v8 = vpack.c.bf16 %v2514_v7, %v2514_v7 }
 0x98d   : > { %1881 = vmatmul.msk.bf16.vlgmr.msrb.gmra.mxu0 %vm455_vm1, %v1109_v8  ;;  %1882 = vmatmul.msk.bf16.vlgmr.msrb.gmra.mxu1 %vm455_vm1, %v1109_v8 }
 0xa0a   : > { %v1122_v9 = vpop.f32.mrf.mxu0  ;;  %v1135_v10 = vpop.f32.mrf.mxu1 }
 0xa0b   : > { %v1123_v13 = vadd.f32 %v1122_v9, %v2364_v5  ;;  %v2522_v15 = vadd.f32 %v1135_v10, %v2368_v11 }
 0xa0d   : > { %1223 = vrot.lane.b32.xlu0 %v2522_v15, %s2125_s19  ;;  %1160 = vrot.lane.b32.xlu2 %v1123_v13, %s2125_s19  ;;  %v1139_v6 = vadd.f32 %v1123_v13, %v2383_v25  ;;  %v1182_v23 = vadd.f32 %v1123_v13, %v2378_v21  ;;  %v1202_v30 = vadd.f32 %v2522_v15, %v992_v54 }
 0xa0f   : > { %v1883_v18 = vmul.f32 -1.442695, %v1139_v6  ;;  %v1884_v26 = vmul.f32 -1.442695, %v1182_v23  ;;  %v1885_v0 = vmul.f32 -1.442695, %v1202_v30 }
 0xa11   : > { %2029 = vpow2.f32 %v1883_v18 }
 0xa12   : > { %v1124_v63 = vpop.f32.mrf.mxu0  ;;  %v1137_v17 = vpop.f32.mrf.mxu1 }
 0xa17   : > { %v2030_v19 = vpop.eup %2029 }
 0xa18   : > { %v1143_v22 = vadd.f32 1.0, %v2030_v19 }
 0xa1a   : > { %2031 = vrcp.f32 %v1143_v22  ;;  %v1155_v36 = vand.u32 2147483648, %v1143_v22  ;;  %vm1149_vm9 = vweird.f32 %v1143_v22  ;;  %v1153_v25 = vand.u32 2147483647, %v1143_v22 }
 0xa1b   : > { %2033 = vpow2.f32 %v1884_v26 }
 0xa1c   : > { %v1156_v62 = vor.u32 1.1754944e-38, %v1155_v36  ;;  %vm1154_vm11 = vcmp.eq.f32.partialorder %v1153_v25, 8.507059e+37  ;;  %v2094_v25 = vld [vmem:[#allocation2 + $0x50] sm:$0xff] }
 0xa20   : > { %v2032_v24 = vpop.eup %2031 }
 0xa21   : > { %v1145_v27 = vmul.f32 %v2032_v24, %v1143_v22  ;;  %v2034_v31 = vpop.eup %2033  ;;  %vm1150_vm8 = vweird.f32 %v2032_v24 }
 0xa22   : > { %v1186_v34 = vadd.f32 1.0, %v2034_v31  ;;  %vm1151_vm10 = vmor %vm1149_vm9, %vm1150_vm8 }
 0xa23   : > { %v1146_v28 = vsub.f32 1.0, %v1145_v27 }
 0xa24   : > { %2035 = vrcp.f32 %v1186_v34  ;;  %v1198_v49 = vand.u32 2147483648, %v1186_v34  ;;  %vm1192_vm13 = vweird.f32 %v1186_v34  ;;  %v1196_v42 = vand.u32 2147483647, %v1186_v34 }
 0xa25   : > { %v1147_v33 = vmul.f32 %v2032_v24, %v1146_v28 }
 0xa26   : > { %v1199_v51 = vor.u32 1.1754944e-38, %v1198_v49  ;;  %vm1197_vm15 = vcmp.eq.f32.partialorder %v1196_v42, 8.507059e+37 }
 0xa27   : > { %v1148_v12 = vadd.f32 %v2032_v24, %v1147_v33 }
 0xa29   : > { %v1152_v35 = vsel %vm1151_vm10, %v2032_v24, %v1148_v12 }
 0xa2a   : > { %v1157_v21 = vsel %vm1154_vm11, %v1156_v62, %v1152_v35  ;;  %v2036_v37 = vpop.eup %2035  ;;  %v2095_v62 = vld [vmem:[#allocation2 + $0x20] sm:$0xff] }
 0xa2b   : > { %v1188_v43 = vmul.f32 %v2036_v37, %v1186_v34  ;;  %vm1193_vm12 = vweird.f32 %v2036_v37  ;;  %v1170_v3 = vsub.f32 1.0, %v1157_v21 }
 0xa2c   : > { %vm1194_vm14 = vmor %vm1192_vm13, %vm1193_vm12 }
 0xa2d   : > { %v1189_v44 = vsub.f32 1.0, %v1188_v43 }
 0xa2f   : > { %v1190_v47 = vmul.f32 %v2036_v37, %v1189_v44 }
 0xa31   : > { %v1191_v48 = vadd.f32 %v2036_v37, %v1190_v47 }
 0xa33   : > { %v1195_v50 = vsel %vm1194_vm14, %v2036_v37, %v1191_v48 }
 0xa34   : > { %v1200_v52 = vsel %vm1197_vm15, %v1199_v51, %v1195_v50 }
 0xa67   : > { %v1161_v39 = vpop.permute.xlu2 %1160 }
 0xa68   : > { %v1163_v41 = vmul.f32 %v1161_v39, %v1157_v21 }
 0xa6a   : > { %1165 = vrot.lane.b32.xlu1 %v1163_v41, %s2125_s19 }
 0xa72   : > { %1177 = vrot.lane.b32.xlu1 %v2514_v7, %s2127_s21 }
 0xa7f   : > { %v1224_v14 = vpop.permute.xlu0 %1223 }
 0xa80   : > { %v1226_v53 = vmul.f32 %v1224_v14, %v1200_v52 }
 0xa82   : > { %1228 = vrot.lane.b32.xlu2 %v1226_v53, %s2125_s19 }
 0xadc   : > { %v1229_v55 = vpop.permute.xlu2 %1228  ;;  %v1166_v56 = vpop.permute.xlu1 %1165 }
 0xadd   : > { %v1231_v57 = vadd.f32 %v1229_v55, %v992_v54  ;;  %v1168_v59 = vadd.f32 %v2093_v58, %v1166_v56 }
 0xadf   : > { %2037 = vtanh.f32 %v1231_v57 }
 0xae0   : > { %2039 = vtanh.f32 %v1168_v59 }
 0xae1   : > { %2041 = vpow2.f32 %v1885_v0 }
 0xae4   : > { %v1178_v40 = vpop.permute.xlu1 %1177 }
 0xae5   : > { %v2038_v60 = vpop.eup %2037 }
 0xae6   : > { %v2040_v61 = vpop.eup %2039  ;;  %1235 = vrot.lane.b32.xlu2 %v2038_v60, %s2126_s20 }
 0xae7   : > { %1172 = vrot.lane.b32.xlu0 %v2040_v61, %s2126_s20  ;;  %v2042_v1 = vpop.eup %2041 }
 0xae8   : > { %v1206_v2 = vadd.f32 1.0, %v2042_v1 }
 0xaea   : > { %2043 = vrcp.f32 %v1206_v2  ;;  %v1218_v45 = vand.u32 2147483648, %v1206_v2  ;;  %vm1212_vm3 = vweird.f32 %v1206_v2  ;;  %v1216_v46 = vand.u32 2147483647, %v1206_v2 }
 0xaec   : > { %v1219_v10 = vor.u32 1.1754944e-38, %v1218_v45  ;;  %vm1217_vm5 = vcmp.eq.f32.partialorder %v1216_v46, 8.507059e+37  ;;  %v844_v46 = vld [vmem:[#allocation2 + $0x28] sm:$0xff] }
 0xaef   : > { %1239 = vrot.lane.b32.xlu0 %v2514_v7, %s2126_s20  ;;  %v1180_v7 = vmul.f32 %v1178_v40, %v1157_v21 }
 0xaf0   : > { %v2044_v16 = vpop.eup %2043 }
 0xaf1   : > { %v1208_v20 = vmul.f32 %v2044_v16, %v1206_v2  ;;  %vm1213_vm2 = vweird.f32 %v2044_v16 }
 0xaf2   : > { %vm1214_vm4 = vmor %vm1212_vm3, %vm1213_vm2 }
 0xaf3   : > { %v1209_v29 = vsub.f32 1.0, %v1208_v20 }
 0xaf5   : > { %v1210_v32 = vmul.f32 %v2044_v16, %v1209_v29 }
 0xaf7   : > { %v1211_v38 = vadd.f32 %v2044_v16, %v1210_v32 }
 0xaf9   : > { %v1215_v8 = vsel %vm1214_vm4, %v2044_v16, %v1211_v38 }
 0xafa   : > { %v1220_v15 = vsel %vm1217_vm5, %v1219_v10, %v1215_v8 }
 0xafb   : > { %v1233_v17 = vsub.f32 1.0, %v1220_v15 }
 0xb40   : > { %v1236_v63 = vpop.permute.xlu2 %1235 }
 0xb41   : > { %v1238_v18 = vmul.f32 %v1236_v63, %v1233_v17 }
 0xb59   : > { %v1173_v4 = vpop.permute.xlu0 %1172 }
 0xb5a   : > { %v1175_v9 = vmul.f32 %v1173_v4, %v1170_v3 }
 0xb5c   : > { %v1181_v13 = vadd.f32 %v1180_v7, %v1175_v9 }
 0xb5e   : > { %1245 = vrot.lane.b32.xlu1 %v1181_v13, %s2126_s20 }
 0xb61   : > { %v1240_v6 = vpop.permute.xlu0 %1239 }
 0xb62   : > { %v1242_v19 = vmul.f32 %v1240_v6, %v1220_v15 }
 0xb64   : > { %v1243_v22 = vadd.f32 %v1242_v19, %v1238_v18 }
 0xb66   : > { %1249 = vrot.lane.b32.xlu2 %v1243_v22, %s2127_s21 }
 0xbc0   : > { %v1250_v23 = vpop.permute.xlu2 %1249 }
 0xbd0   : > { %v1246_v24 = vpop.permute.xlu1 %1245 }
 0xbd1   : > { %v2541_v26 = vsel %vm383_vm0, %v1246_v24, %v1250_v23 }
 0xbd2   : > { %v1253_v27 = vpack.c.bf16 %v2541_v26, %v2541_v26 }
 0xbd4   : > { %1886 = vmatmul.msk.bf16.vlgmr.msra.gmra.mxu2 %vm455_vm1, %v1253_v27  ;;  %1887 = vmatmul.msk.bf16.vlgmr.msra.gmra.mxu3 %vm455_vm1, %v1253_v27 }
 0xc57   : > { %v1266_v28 = vpop.f32.mrf.mxu2  ;;  %v1279_v31 = vpop.f32.mrf.mxu3 }
 0xc58   : > { %v1267_v33 = vadd.f32 %v1266_v28, %v2364_v5  ;;  %v2549_v34 = vadd.f32 %v1279_v31, %v2368_v11 }
 0xc5a   : > { %1367 = vrot.lane.b32.xlu1 %v2549_v34, %s2125_s19  ;;  %1304 = vrot.lane.b32.xlu0 %v1267_v33, %s2125_s19  ;;  %v1283_v35 = vadd.f32 %v2094_v25, %v1267_v33  ;;  %v1326_v39 = vadd.f32 %v2095_v62, %v1267_v33  ;;  %v1346_v8 = vadd.f32 %v2549_v34, %v844_v46 }
 0xc5c   : > { %v1888_v21 = vmul.f32 -1.442695, %v1283_v35  ;;  %v1889_v41 = vmul.f32 -1.442695, %v1326_v39  ;;  %v1890_v9 = vmul.f32 -1.442695, %v1346_v8 }
 0xc5e   : > { %2045 = vpow2.f32 %v1888_v21 }
 0xc5f   : > { %v1268_v12 = vpop.f32.mrf.mxu2  ;;  %v1281_v36 = vpop.f32.mrf.mxu3  ;;  %2047 = vpow2.f32 %v1889_v41 }
 0xc64   : > { %v2046_v37 = vpop.eup %2045 }
 0xc65   : > { %v2048_v43 = vpop.eup %2047  ;;  %v1287_v44 = vadd.f32 1.0, %v2046_v37 }
 0xc66   : > { %v1330_v47 = vadd.f32 1.0, %v2048_v43 }
 0xc67   : > { %2049 = vrcp.f32 %v1287_v44  ;;  %vm1293_vm8 = vweird.f32 %v1287_v44  ;;  %v1299_v57 = vand.u32 2147483648, %v1287_v44  ;;  %v1297_v59 = vand.u32 2147483647, %v1287_v44 }
 0xc68   : > { %2051 = vrcp.f32 %v1330_v47  ;;  %v1342_v56 = vand.u32 2147483648, %v1330_v47  ;;  %vm1336_vm9 = vweird.f32 %v1330_v47  ;;  %v1340_v58 = vand.u32 2147483647, %v1330_v47 }
 0xc69   : > { %v1300_v0 = vor.u32 1.1754944e-38, %v1299_v57  ;;  %vm1298_vm13 = vcmp.eq.f32.partialorder %v1297_v59, 8.507059e+37 }
 0xc6a   : > { %v1343_v30 = vor.u32 1.1754944e-38, %v1342_v56  ;;  %vm1341_vm12 = vcmp.eq.f32.partialorder %v1340_v58, 8.507059e+37  ;;  %v2097_v56 = vld [vmem:[#allocation2 + $0x60] sm:$0xff] }
 0xc6d   : > { %v2050_v48 = vpop.eup %2049 }
 0xc6e   : > { %v2052_v49 = vpop.eup %2051  ;;  %v1289_v50 = vmul.f32 %v2050_v48, %v1287_v44  ;;  %vm1294_vm6 = vweird.f32 %v2050_v48 }
 0xc6f   : > { %v1332_v42 = vmul.f32 %v2052_v49, %v1330_v47  ;;  %vm1337_vm7 = vweird.f32 %v2052_v49  ;;  %vm1295_vm10 = vmor %vm1293_vm8, %vm1294_vm6 }
 0xc70   : > { %v1290_v14 = vsub.f32 1.0, %v1289_v50  ;;  %vm1338_vm11 = vmor %vm1336_vm9, %vm1337_vm7 }
 0xc71   : > { %v1333_v51 = vsub.f32 1.0, %v1332_v42 }
 0xc72   : > { %v1291_v53 = vmul.f32 %v2050_v48, %v1290_v14  ;;  %v2096_v14 = vld [vmem:[#allocation2 + $0x10] sm:$0xff] }
 0xc73   : > { %v1334_v52 = vmul.f32 %v2052_v49, %v1333_v51 }
 0xc74   : > { %v1292_v55 = vadd.f32 %v2050_v48, %v1291_v53 }
 0xc75   : > { %v1335_v54 = vadd.f32 %v2052_v49, %v1334_v52 }
 0xc76   : > { %v1296_v61 = vsel %vm1295_vm10, %v2050_v48, %v1292_v55 }
 0xc77   : > { %v1339_v60 = vsel %vm1338_vm11, %v2052_v49, %v1335_v54  ;;  %v1301_v20 = vsel %vm1298_vm13, %v1300_v0, %v1296_v61 }
 0xc78   : > { %v1344_v2 = vsel %vm1341_vm12, %v1343_v30, %v1339_v60  ;;  %v1314_v17 = vsub.f32 1.0, %v1301_v20 }
 0xccc   : > { %v1368_v1 = vpop.permute.xlu1 %1367  ;;  %v1305_v16 = vpop.permute.xlu0 %1304 }
 0xccd   : > { %v1370_v29 = vmul.f32 %v1368_v1, %v1344_v2  ;;  %v1307_v32 = vmul.f32 %v1305_v16, %v1301_v20 }
 0xccf   : > { %1372 = vrot.lane.b32.xlu0 %v1370_v29, %s2125_s19  ;;  %1309 = vrot.lane.b32.xlu2 %v1307_v32, %s2125_s19 }
 0xcd7   : > { %1321 = vrot.lane.b32.xlu2 %v2541_v26, %s2127_s21 }
 0xd29   : > { %v1310_v38 = vpop.permute.xlu2 %1309 }
 0xd2a   : > { %v1312_v40 = vadd.f32 %v2094_v25, %v1310_v38 }
 0xd2c   : > { %2053 = vtanh.f32 %v1312_v40 }
 0xd31   : > { %v1322_v63 = vpop.permute.xlu2 %1321 }
 0xd32   : > { %v2054_v45 = vpop.eup %2053  ;;  %v1324_v18 = vmul.f32 %v1322_v63, %v1301_v20 }
 0xd33   : > { %1316 = vrot.lane.b32.xlu1 %v2054_v45, %s2126_s20 }
 0xd3b   : > { %1383 = vrot.lane.b32.xlu1 %v2541_v26, %s2126_s20 }
 0xd41   : > { %v1373_v3 = vpop.permute.xlu0 %1372 }
 0xd42   : > { %v1375_v4 = vadd.f32 %v1373_v3, %v844_v46 }
 0xd44   : > { %2055 = vtanh.f32 %v1375_v4 }
 0xd45   : > { %2057 = vpow2.f32 %v1890_v9 }
 0xd4a   : > { %v2056_v7 = vpop.eup %2055 }
 0xd4b   : > { %1379 = vrot.lane.b32.xlu0 %v2056_v7, %s2126_s20  ;;  %v2058_v10 = vpop.eup %2057 }
 0xd4c   : > { %v1350_v13 = vadd.f32 1.0, %v2058_v10 }
 0xd4e   : > { %2059 = vrcp.f32 %v1350_v13  ;;  %v1362_v28 = vand.u32 2147483648, %v1350_v13  ;;  %vm1356_vm15 = vweird.f32 %v1350_v13  ;;  %v1360_v31 = vand.u32 2147483647, %v1350_v13 }
 0xd50   : > { %v1363_v34 = vor.u32 1.1754944e-38, %v1362_v28  ;;  %vm1361_vm3 = vcmp.eq.f32.partialorder %v1360_v31, 8.507059e+37 }
 0xd54   : > { %v2060_v15 = vpop.eup %2059 }
 0xd55   : > { %v1352_v22 = vmul.f32 %v2060_v15, %v1350_v13  ;;  %vm1357_vm14 = vweird.f32 %v2060_v15 }
 0xd56   : > { %vm1358_vm2 = vmor %vm1356_vm15, %vm1357_vm14 }
 0xd57   : > { %v1353_v24 = vsub.f32 1.0, %v1352_v22 }
 0xd59   : > { %v1354_v26 = vmul.f32 %v2060_v15, %v1353_v24 }
 0xd5b   : > { %v1355_v27 = vadd.f32 %v2060_v15, %v1354_v26 }
 0xd5d   : > { %v1359_v33 = vsel %vm1358_vm2, %v2060_v15, %v1355_v27 }
 0xd5e   : > { %v1364_v12 = vsel %vm1361_vm3, %v1363_v34, %v1359_v33 }
 0xd5f   : > { %v1377_v25 = vsub.f32 1.0, %v1364_v12 }
 0xda5   : > { %v1317_v6 = vpop.permute.xlu1 %1316 }
 0xda6   : > { %v1319_v19 = vmul.f32 %v1317_v6, %v1314_v17 }
 0xda8   : > { %v1325_v23 = vadd.f32 %v1324_v18, %v1319_v19  ;;  %v696_v18 = vld [vmem:[#allocation2 + $0x18] sm:$0xff] }
 0xdaa   : > { %1389 = vrot.lane.b32.xlu2 %v1325_v23, %s2126_s20 }
 0xdad   : > { %v1384_v36 = vpop.permute.xlu1 %1383 }
 0xdae   : > { %v1386_v62 = vmul.f32 %v1384_v36, %v1364_v12 }
 0xdbd   : > { %v1380_v35 = vpop.permute.xlu0 %1379 }
 0xdbe   : > { %v1382_v39 = vmul.f32 %v1380_v35, %v1377_v25 }
 0xdc0   : > { %v1387_v21 = vadd.f32 %v1386_v62, %v1382_v39 }
 0xdc2   : > { %1393 = vrot.lane.b32.xlu0 %v1387_v21, %s2127_s21 }
 0xe04   : > { %v1390_v41 = vpop.permute.xlu2 %1389 }
 0xe34   : > { %v1394_v37 = vpop.permute.xlu0 %1393 }
 0xe35   : > { %v2566_v43 = vsel %vm383_vm0, %v1390_v41, %v1394_v37 }
 0xe36   : > { %v1397_v44 = vpack.c.bf16 %v2566_v43, %v2566_v43 }
 0xe38   : > { %1891 = vmatmul.msk.bf16.vlgmr.msra.gmra.mxu0 %vm455_vm1, %v1397_v44  ;;  %1892 = vmatmul.msk.bf16.vlgmr.msra.gmra.mxu1 %vm455_vm1, %v1397_v44 }
 0xeb5   : > { %v1410_v47 = vpop.f32.mrf.mxu0  ;;  %v1423_v48 = vpop.f32.mrf.mxu1 }
 0xeb6   : > { %v1411_v49 = vadd.f32 %v1410_v47, %v2364_v5  ;;  %v2574_v42 = vadd.f32 %v1423_v48, %v2368_v11 }
 0xeb8   : > { %1511 = vrot.lane.b32.xlu2 %v2574_v42, %s2125_s19  ;;  %1448 = vrot.lane.b32.xlu1 %v1411_v49, %s2125_s19  ;;  %v1470_v52 = vadd.f32 %v2096_v14, %v1411_v49  ;;  %v1427_v57 = vadd.f32 %v2097_v56, %v1411_v49  ;;  %v1490_v28 = vadd.f32 %v2574_v42, %v696_v18 }
 0xeba   : > { %v1894_v53 = vmul.f32 -1.442695, %v1470_v52  ;;  %v1893_v59 = vmul.f32 -1.442695, %v1427_v57  ;;  %v1895_v31 = vmul.f32 -1.442695, %v1490_v28 }
 0xebc   : > { %2061 = vpow2.f32 %v1894_v53 }
 0xebd   : > { %v1412_v50 = vpop.f32.mrf.mxu0  ;;  %v1425_v51 = vpop.f32.mrf.mxu1 }
 0xec2   : > { %v2062_v54 = vpop.eup %2061 }
 0xec3   : > { %v1474_v55 = vadd.f32 1.0, %v2062_v54 }
 0xec5   : > { %2063 = vrcp.f32 %v1474_v55  ;;  %v1486_v16 = vand.u32 2147483648, %v1474_v55  ;;  %vm1480_vm5 = vweird.f32 %v1474_v55  ;;  %v1484_v20 = vand.u32 2147483647, %v1474_v55 }
 0xec6   : > { %2065 = vpow2.f32 %v1893_v59 }
 0xec7   : > { %v1487_v32 = vor.u32 1.1754944e-38, %v1486_v16  ;;  %vm1485_vm7 = vcmp.eq.f32.partialorder %v1484_v20, 8.507059e+37  ;;  %v2098_v16 = vld [vmem:[#allocation2 + $0x70] sm:$0xff] }
 0xecb   : > { %v2064_v58 = vpop.eup %2063 }
 0xecc   : > { %v1476_v60 = vmul.f32 %v2064_v58, %v1474_v55  ;;  %v2066_v30 = vpop.eup %2065  ;;  %vm1481_vm4 = vweird.f32 %v2064_v58 }
 0xecd   : > { %v1431_v1 = vadd.f32 1.0, %v2066_v30  ;;  %vm1482_vm6 = vmor %vm1480_vm5, %vm1481_vm4 }
 0xece   : > { %v1477_v61 = vsub.f32 1.0, %v1476_v60 }
 0xecf   : > { %2067 = vrcp.f32 %v1431_v1  ;;  %v1443_v9 = vand.u32 2147483648, %v1431_v1  ;;  %vm1437_vm9 = vweird.f32 %v1431_v1  ;;  %v1441_v10 = vand.u32 2147483647, %v1431_v1 }
 0xed0   : > { %v1478_v0 = vmul.f32 %v2064_v58, %v1477_v61 }
 0xed1   : > { %v1444_v15 = vor.u32 1.1754944e-38, %v1443_v9  ;;  %vm1442_vm11 = vcmp.eq.f32.partialorder %v1441_v10, 8.507059e+37 }
 0xed2   : > { %v1479_v2 = vadd.f32 %v2064_v58, %v1478_v0 }
 0xed4   : > { %v1483_v29 = vsel %vm1482_vm6, %v2064_v58, %v1479_v2 }
 0xed5   : > { %v1488_v40 = vsel %vm1485_vm7, %v1487_v32, %v1483_v29  ;;  %v2068_v46 = vpop.eup %2067 }
 0xed6   : > { %v1433_v3 = vmul.f32 %v2068_v46, %v1431_v1  ;;  %vm1438_vm8 = vweird.f32 %v2068_v46 }
 0xed7   : > { %vm1439_vm10 = vmor %vm1437_vm9, %vm1438_vm8 }
 0xed8   : > { %v1434_v4 = vsub.f32 1.0, %v1433_v3 }
 0xeda   : > { %v1435_v7 = vmul.f32 %v2068_v46, %v1434_v4 }
 0xedc   : > { %v1436_v8 = vadd.f32 %v2068_v46, %v1435_v7 }
 0xede   : > { %v1440_v13 = vsel %vm1439_vm10, %v2068_v46, %v1436_v8 }
 0xedf   : > { %v1445_v17 = vsel %vm1442_vm11, %v1444_v15, %v1440_v13 }
 0xee0   : > { %v1458_v37 = vsub.f32 1.0, %v1445_v17 }
 0xf12   : > { %v1512_v38 = vpop.permute.xlu2 %1511 }
 0xf13   : > { %v1514_v45 = vmul.f32 %v1512_v38, %v1488_v40  ;;  %v2099_v40 = vld [vmem:[#allocation2] sm:$0xff] }
 0xf15   : > { %1516 = vrot.lane.b32.xlu1 %v1514_v45, %s2125_s19 }
 0xf2a   : > { %v1449_v63 = vpop.permute.xlu1 %1448 }
 0xf2b   : > { %v1451_v6 = vmul.f32 %v1449_v63, %v1445_v17 }
 0xf2d   : > { %1453 = vrot.lane.b32.xlu0 %v1451_v6, %s2125_s19 }
 0xf35   : > { %1465 = vrot.lane.b32.xlu0 %v2566_v43, %s2127_s21 }
 0xf87   : > { %v1517_v19 = vpop.permute.xlu1 %1516 }
 0xf88   : > { %v1519_v22 = vadd.f32 %v1517_v19, %v696_v18 }
 0xf8a   : > { %2069 = vtanh.f32 %v1519_v22 }
 0xf90   : > { %v2070_v23 = vpop.eup %2069 }
 0xf91   : > { %1523 = vrot.lane.b32.xlu1 %v2070_v23, %s2126_s20 }
 0xf9f   : > { %v1454_v24 = vpop.permute.xlu0 %1453 }
 0xfa0   : > { %v1456_v26 = vadd.f32 %v2097_v56, %v1454_v24 }
 0xfa2   : > { %2071 = vtanh.f32 %v1456_v26 }
 0xfa3   : > { %2073 = vpow2.f32 %v1895_v31 }
 0xfa7   : > { %v1466_v39 = vpop.permute.xlu0 %1465 }
 0xfa8   : > { %v2072_v27 = vpop.eup %2071  ;;  %v1468_v44 = vmul.f32 %v1466_v39, %v1445_v17 }
 0xfa9   : > { %1460 = vrot.lane.b32.xlu2 %v2072_v27, %s2126_s20  ;;  %v2074_v33 = vpop.eup %2073 }
 0xfaa   : > { %v1494_v34 = vadd.f32 1.0, %v2074_v33 }
 0xfac   : > { %2075 = vrcp.f32 %v1494_v34  ;;  %v1506_v21 = vand.u32 2147483648, %v1494_v34  ;;  %vm1500_vm13 = vweird.f32 %v1494_v34  ;;  %v1504_v41 = vand.u32 2147483647, %v1494_v34 }
 0xfae   : > { %v1507_v49 = vor.u32 1.1754944e-38, %v1506_v21  ;;  %vm1505_vm15 = vcmp.eq.f32.partialorder %v1504_v41, 8.507059e+37 }
 0xfb1   : > { %1527 = vrot.lane.b32.xlu2 %v2566_v43, %s2126_s20 }
 0xfb2   : > { %v2076_v12 = vpop.eup %2075 }
 0xfb3   : > { %v1496_v36 = vmul.f32 %v2076_v12, %v1494_v34  ;;  %vm1501_vm12 = vweird.f32 %v2076_v12 }
 0xfb4   : > { %vm1502_vm14 = vmor %vm1500_vm13, %vm1501_vm12 }
 0xfb5   : > { %v1497_v25 = vsub.f32 1.0, %v1496_v36 }
 0xfb7   : > { %v1498_v35 = vmul.f32 %v2076_v12, %v1497_v25  ;;  %v555_v25 = vld [vmem:[#allocation2 + $0x8] sm:$0xff] }
 0xfb9   : > { %v1499_v62 = vadd.f32 %v2076_v12, %v1498_v35 }
 0xfbb   : > { %v1503_v47 = vsel %vm1502_vm14, %v2076_v12, %v1499_v62 }
 0xfbc   : > { %v1508_v50 = vsel %vm1505_vm15, %v1507_v49, %v1503_v47 }
 0xfbd   : > { %v1521_v14 = vsub.f32 1.0, %v1508_v50 }
0x1003   : > { %v1461_v43 = vpop.permute.xlu2 %1460  ;;  %v1524_v51 = vpop.permute.xlu1 %1523 }
0x1004   : > { %v1463_v48 = vmul.f32 %v1461_v43, %v1458_v37  ;;  %v1526_v53 = vmul.f32 %v1524_v51, %v1521_v14 }
0x1006   : > { %v1469_v42 = vadd.f32 %v1468_v44, %v1463_v48 }
0x1008   : > { %1533 = vrot.lane.b32.xlu0 %v1469_v42, %s2126_s20 }
0x100b   : > { %v1528_v52 = vpop.permute.xlu2 %1527 }
0x100c   : > { %v1530_v54 = vmul.f32 %v1528_v52, %v1508_v50 }
0x100e   : > { %v1531_v55 = vadd.f32 %v1530_v54, %v1526_v53 }
0x1010   : > { %1537 = vrot.lane.b32.xlu1 %v1531_v55, %s2127_s21 }
0x107a   : > { %v1534_v56 = vpop.permute.xlu0 %1533 }
0x1082   : > { %v1538_v57 = vpop.permute.xlu1 %1537 }
0x1083   : > { %v2591_v58 = vsel %vm383_vm0, %v1534_v56, %v1538_v57 }
0x1084   : > { %v1541_v59 = vpack.c.bf16 %v2591_v58, %v2591_v58 }
0x1086   : > { %1896 = vmatmul.msk.bf16.vlgmr.msrb.gmra.mxu2 %vm455_vm1, %v1541_v59  ;;  %1897 = vmatmul.msk.bf16.vlgmr.msrb.gmra.mxu3 %vm455_vm1, %v1541_v59 }
0x1109   : > { %v1554_v60 = vpop.f32.mrf.mxu2  ;;  %v1567_v61 = vpop.f32.mrf.mxu3 }
0x110a   : > { %v1555_v30 = vadd.f32 %v1554_v60, %v2364_v5  ;;  %v2599_v0 = vadd.f32 %v1567_v61, %v2368_v11 }
0x110c   : > { %1655 = vrot.lane.b32.xlu0 %v2599_v0, %s2125_s19  ;;  %1592 = vrot.lane.b32.xlu2 %v1555_v30, %s2125_s19  ;;  %v1571_v20 = vadd.f32 %v2098_v16, %v1555_v30  ;;  %v1614_v45 = vadd.f32 %v2099_v40, %v1555_v30  ;;  %v1634_v43 = vadd.f32 %v2599_v0, %v555_v25  ;;  %v1933_v40 = vld [vmem:[%s2654_s5 + $0x8] sm:$0xff] }
0x110e   : > { %v1898_v29 = vmul.f32 -1.442695, %v1571_v20  ;;  %v1899_v46 = vmul.f32 -1.442695, %v1614_v45  ;;  %v1900_v44 = vmul.f32 -1.442695, %v1634_v43 }
0x110f   : > { %v1932_v45 = vld [vmem:[%s2654_s5] sm:$0xff] }
0x1110   : > { %2077 = vpow2.f32 %v1898_v29 }
0x1111   : > { %v1556_v1 = vpop.f32.mrf.mxu2  ;;  %v1569_v2 = vpop.f32.mrf.mxu3 }
0x1116   : > { %v2078_v32 = vpop.eup %2077 }
0x1117   : > { %v1575_v38 = vadd.f32 1.0, %v2078_v32  ;;  %v1935_v32 = vld [vmem:[%s2654_s5 + $0x18] sm:$0xff] }
0x1118   : > { %1729 = vmatpush.bf16.msrb.mxu0 %v1935_v32 }
0x1119   : > { %2079 = vrcp.f32 %v1575_v38  ;;  %v1587_v10 = vand.u32 2147483648, %v1575_v38  ;;  %vm1581_vm3 = vweird.f32 %v1575_v38  ;;  %v1585_v13 = vand.u32 2147483647, %v1575_v38 }
0x111a   : > { %2081 = vpow2.f32 %v1899_v46 }
0x111b   : > { %v1588_v63 = vor.u32 1.1754944e-38, %v1587_v10  ;;  %vm1586_vm5 = vcmp.eq.f32.partialorder %v1585_v13, 8.507059e+37 }
0x111f   : > { %v2080_v5 = vpop.eup %2079 }
0x1120   : > { %v1577_v11 = vmul.f32 %v2080_v5, %v1575_v38  ;;  %v2082_v4 = vpop.eup %2081  ;;  %vm1582_vm2 = vweird.f32 %v2080_v5  ;;  %v1934_v38 = vld [vmem:[%s2654_s5 + $0x10] sm:$0xff] }
0x1121   : > { %v1618_v8 = vadd.f32 1.0, %v2082_v4  ;;  %vm1583_vm4 = vmor %vm1581_vm3, %vm1582_vm2  ;;  %1730 = vmatpush.bf16.msrb.mxu0 %v1934_v38  ;;  %v1964_v4 = vld [vmem:[%s2655_s6] ss:$0 sm:$0xff] }
0x1122   : > { %v1578_v3 = vsub.f32 1.0, %v1577_v11 }
0x1123   : > { %2083 = vrcp.f32 %v1618_v8  ;;  %v1630_v27 = vand.u32 2147483648, %v1618_v8  ;;  %vm1624_vm7 = vweird.f32 %v1618_v8  ;;  %v1628_v28 = vand.u32 2147483647, %v1618_v8 }
0x1124   : > { %v1579_v7 = vmul.f32 %v2080_v5, %v1578_v3 }
0x1125   : > { %v1631_v33 = vor.u32 1.1754944e-38, %v1630_v27  ;;  %vm1629_vm9 = vcmp.eq.f32.partialorder %v1628_v28, 8.507059e+37  ;;  %1731 = vmatpush.bf16.msrb.mxu0 %v1933_v40 }
0x1126   : > { %v1580_v9 = vadd.f32 %v2080_v5, %v1579_v7 }
0x1128   : > { %v1584_v15 = vsel %vm1583_vm4, %v2080_v5, %v1580_v9 }
0x1129   : > { %v1589_v6 = vsel %vm1586_vm5, %v1588_v63, %v1584_v15  ;;  %v2084_v19 = vpop.eup %2083  ;;  %1732 = vmatpush.bf16.msrb.mxu0 %v1932_v45 }
0x112a   : > { %v1620_v22 = vmul.f32 %v2084_v19, %v1618_v8  ;;  %vm1625_vm6 = vweird.f32 %v2084_v19  ;;  %v1602_v55 = vsub.f32 1.0, %v1589_v6 }
0x112b   : > { %vm1626_vm8 = vmor %vm1624_vm7, %vm1625_vm6 }
0x112c   : > { %v1621_v23 = vsub.f32 1.0, %v1620_v22 }
0x112e   : > { %v1622_v24 = vmul.f32 %v2084_v19, %v1621_v23 }
0x1130   : > { %v1623_v26 = vadd.f32 %v2084_v19, %v1622_v24 }
0x1132   : > { %v1627_v31 = vsel %vm1626_vm8, %v2084_v19, %v1623_v26 }
0x1133   : > { %v1632_v12 = vsel %vm1629_vm9, %v1631_v33, %v1627_v31 }
0x1166   : > { %v1593_v17 = vpop.permute.xlu2 %1592 }
0x1167   : > { %v1595_v18 = vmul.f32 %v1593_v17, %v1589_v6 }
0x1169   : > { %1597 = vrot.lane.b32.xlu1 %v1595_v18, %s2125_s19 }
0x1171   : > { %1609 = vrot.lane.b32.xlu1 %v2591_v58, %s2127_s21 }
0x117e   : > { %v1656_v34 = vpop.permute.xlu0 %1655 }
0x117f   : > { %v1658_v36 = vmul.f32 %v1656_v34, %v1632_v12 }
0x1181   : > { %1660 = vrot.lane.b32.xlu2 %v1658_v36, %s2125_s19 }
0x11db   : > { %v1661_v35 = vpop.permute.xlu2 %1660  ;;  %v1598_v62 = vpop.permute.xlu1 %1597 }
0x11dc   : > { %v1663_v39 = vadd.f32 %v1661_v35, %v555_v25  ;;  %v1600_v21 = vadd.f32 %v2098_v16, %v1598_v62 }
0x11de   : > { %2085 = vtanh.f32 %v1663_v39 }
0x11df   : > { %2087 = vtanh.f32 %v1600_v21 }
0x11e0   : > { %2089 = vpow2.f32 %v1900_v44 }
0x11e3   : > { %v1610_v52 = vpop.permute.xlu1 %1609 }
0x11e4   : > { %v2086_v41 = vpop.eup %2085  ;;  %v1612_v57 = vmul.f32 %v1610_v52, %v1589_v6 }
0x11e5   : > { %v2088_v37 = vpop.eup %2087  ;;  %1667 = vrot.lane.b32.xlu2 %v2086_v41, %s2126_s20 }
0x11e6   : > { %1604 = vrot.lane.b32.xlu0 %v2088_v37, %s2126_s20  ;;  %v2090_v47 = vpop.eup %2089 }
0x11e7   : > { %v1638_v48 = vadd.f32 1.0, %v2090_v47 }
0x11e9   : > { %2091 = vrcp.f32 %v1638_v48  ;;  %v1650_v53 = vand.u32 2147483648, %v1638_v48  ;;  %vm1644_vm11 = vweird.f32 %v1638_v48  ;;  %v1648_v54 = vand.u32 2147483647, %v1638_v48 }
0x11eb   : > { %v1651_v60 = vor.u32 1.1754944e-38, %v1650_v53  ;;  %vm1649_vm13 = vcmp.eq.f32.partialorder %v1648_v54, 8.507059e+37 }
0x11ee   : > { %1671 = vrot.lane.b32.xlu0 %v2591_v58, %s2126_s20 }
0x11ef   : > { %v2092_v49 = vpop.eup %2091 }
0x11f0   : > { %v1640_v42 = vmul.f32 %v2092_v49, %v1638_v48  ;;  %vm1645_vm10 = vweird.f32 %v2092_v49 }
0x11f1   : > { %vm1646_vm12 = vmor %vm1644_vm11, %vm1645_vm10 }
0x11f2   : > { %v1641_v50 = vsub.f32 1.0, %v1640_v42 }
0x11f4   : > { %v1642_v51 = vmul.f32 %v2092_v49, %v1641_v50 }
0x11f6   : > { %v1643_v14 = vadd.f32 %v2092_v49, %v1642_v51 }
0x11f8   : > { %v1647_v58 = vsel %vm1646_vm12, %v2092_v49, %v1643_v14 }
0x11f9   : > { %v1652_v30 = vsel %vm1649_vm13, %v1651_v60, %v1647_v58 }
0x11fa   : > { %v1665_v1 = vsub.f32 1.0, %v1652_v30 }
0x123f   : > { %v1668_v0 = vpop.permute.xlu2 %1667 }
0x1240   : > { %v1670_v16 = vmul.f32 %v1668_v0, %v1665_v1 }
0x1258   : > { %v1605_v56 = vpop.permute.xlu0 %1604 }
0x1259   : > { %v1607_v59 = vmul.f32 %v1605_v56, %v1602_v55 }
0x125b   : > { %v1613_v61 = vadd.f32 %v1612_v57, %v1607_v59 }
0x125d   : > { %1677 = vrot.lane.b32.xlu1 %v1613_v61, %s2126_s20 }
0x1260   : > { %v1672_v2 = vpop.permute.xlu0 %1671 }
0x1261   : > { %v1674_v20 = vmul.f32 %v1672_v2, %v1652_v30 }
0x1263   : > { %v1675_v29 = vadd.f32 %v1674_v20, %v1670_v16 }
0x1265   : > { %1681 = vrot.lane.b32.xlu2 %v1675_v29, %s2127_s21 }
0x12bf   : > { %v1682_v5 = vpop.permute.xlu2 %1681 }
0x12cf   : > { %v1678_v46 = vpop.permute.xlu1 %1677 }
0x12d0   : > { %v1684_v11 = vsel %vm383_vm0, %v1678_v46, %v1682_v5 }
0x12d1   : > { %v1685_v3 = vpack.c.bf16 %v1684_v11, %v1684_v11 }
0x12d3   : > { %1917 = vmatmul.msk.bf16.vlgmr.msrb.gmra.mxu0 %vm455_vm1, %v1685_v3 }
0x1350   : > { %v1734_v7 = vpop.f32.mrf.mxu0 }
0x1351   : > { %v1735_v8 = vadd.f32 %v1964_v4, %v1734_v7 }
0x1353   : > { %1738 = vst [vmem:[%s339_s17] sm:$0xff] %v1735_v8 }
0x1358   : > { %v1736_v9 = vpop.f32.mrf.mxu0 }
0x1359 PF: > { %p14_p9 = scmp.ge.s32.totalorder %s2185_s28, 4   ;;  %s2657_s24 = smov %s2118_s25 }
0x135a   : > { %s2658_s25 = smov %s2194_s8  ;;  %s2659_s26 = smov %s2185_s28 }
0x135b   :  { %16 = sbr.rel (!%p14_p9) target bundleno = 2 (0x2), region = 121 }

</bundles_post_ra>
